<compile_context>
chip_gen: v6e
topology: v6e:2x2x1
jax: 0.10.0
libtpu: 0.0.40
codegen_flags: <defaults>
</compile_context>

<pallas_src>
import functools

import jax
import jax.numpy as jnp
from jax.experimental import pallas as pl
from jax.experimental.pallas import tpu as pltpu


def _round_up(x, m):
    return (x + m - 1) // m * m


# Raised scoped-VMEM budget: above v5e's 16 MiB default, within v7x's 64 MiB
# physical per-TC.
_VMEM_LIMIT = 48 * 1024 * 1024


# ----------------------------------------------------------------------------
# Pallas kernels
# ----------------------------------------------------------------------------
def _mm_bias_relu_kernel(x_ref, w_ref, b_ref, o_ref):
    # x: [TM, K] bf16, w: [K, N] bf16, b: [1, N] f32 -> o: [TM, N] bf16
    acc = jnp.dot(x_ref[...], w_ref[...], preferred_element_type=jnp.float32)
    o_ref[...] = jnp.maximum(acc + b_ref[...], 0.0).astype(o_ref.dtype)


def _conv3_pool_fc_kernel(p_ref, w3_ref, b3_ref, pool_ref, wfc_ref, bfc_ref,
                          o_ref):
    # p:    [TB*S, K3] bf16   im2col patches of the conv-3 input, rows grouped
    #                         per image (row = b*S + s)
    # w3:   [K3, C] bf16, b3: [1, C] f32
    # pool: [TB, TB*S] f32    precomputed block-diagonal mean matrix (1/S)
    # wfc:  [C, OP] bf16, bfc: [1, OP] f32   (OP = class dim padded to 128)
    # o:    [TB, OP] f32
    h = jnp.dot(p_ref[...], w3_ref[...], preferred_element_type=jnp.float32)
    h = jnp.maximum(h + b3_ref[...], 0.0)                       # [TB*S, C] f32

    # AdaptiveAvgPool2d((1,1)): per-image spatial mean via a resident pooling
    # matrix (kept in f32 for an exact mean).
    feat = jnp.dot(pool_ref[...], h, preferred_element_type=jnp.float32)

    # Linear(256 -> num_classes) on the MXU in bf16, lane-dense class dim.
    o_ref[...] = (jnp.dot(feat.astype(jnp.bfloat16), wfc_ref[...],
                          preferred_element_type=jnp.float32) + bfc_ref[...])


# ----------------------------------------------------------------------------
# Pallas wrappers
# ----------------------------------------------------------------------------
def _pick_tm(m, tm):
    """Row tile <= tm, sublane-aligned, with >=2 grid steps when m allows
    (so both v7x TensorCores get work at small batch)."""
    if m <= 16:
        return _round_up(m, 8)
    return min(tm, _round_up(pl.cdiv(m, 2), 16))


def matmul_bias_relu(x, w, b, *, tm=1024):
    """relu(x @ w + b) with x:[M,K] bf16, w:[K,N] bf16, b:[1,N] f32 -> bf16."""
    m, k = x.shape
    k2, n = w.shape
    assert k == k2

    tm_ = _pick_tm(m, tm)
    mp = _round_up(m, tm_)
    if mp != m:
        # Only triggers for awkward M; tile choice divides M at these sizes.
        x = jnp.pad(x, ((0, mp - m), (0, 0)))
    steps = mp // tm_

    # Deeper row-tile buffering once the grid is long enough to benefit
    # (hides the patch DMA behind the small matmul on v5e).
    x_spec = (pl.BlockSpec((tm_, k), lambda i: (i, 0),
                           pipeline_mode=pl.Buffered(3))
              if steps >= 4 else pl.BlockSpec((tm_, k), lambda i: (i, 0)))

    cost = pl.CostEstimate(
        flops=2 * mp * k * n,
        transcendentals=0,
        bytes_accessed=mp * k * 2 + k * n * 2 + n * 4 + mp * n * 2,
    )

    out = pl.pallas_call(
        _mm_bias_relu_kernel,
        out_shape=jax.ShapeDtypeStruct((mp, n), jnp.bfloat16),
        grid=(steps,),
        in_specs=[
            x_spec,                                      # row tile, pipelined
            pl.BlockSpec((k, n), lambda i: (0, 0)),      # weights resident
            pl.BlockSpec((1, n), lambda i: (0, 0)),      # bias resident
        ],
        out_specs=pl.BlockSpec((tm_, n), lambda i: (i, 0)),
        compiler_params=pltpu.CompilerParams(
            dimension_semantics=("parallel",),           # megacore on v7x
            vmem_limit_bytes=_VMEM_LIMIT,
        ),
        cost_estimate=cost,
    )(x.astype(jnp.bfloat16), w, b)
    return out[:m] if mp != m else out


def conv3_pool_fc(patches, s, w3, b3, wfc_p, bfc_p, *, tb_max=8):
    """Fused conv3-as-matmul + ReLU + AdaptiveAvgPool2d((1,1)) + Linear.

    patches: [N*s, K3] bf16 im2col patches of the conv-3 input (rows grouped
             per image), s = OH3*OW3, w3: [K3, 256] bf16, wfc_p: [256, OP] bf16.
    Returns padded logits [N, OP] in f32.
    """
    ms, k = patches.shape
    assert ms % s == 0
    n = ms // s
    k2, c = w3.shape
    assert k == k2
    c2, op = wfc_p.shape
    assert c == c2

    # Batch tile is always capped (bounded VMEM on v7x); pad the batch to a
    # multiple of the tile instead of taking the whole batch in one block.
    tb = min(tb_max, n)
    npad = _round_up(n, tb)
    if npad != n:
        patches = jnp.pad(patches, ((0, (npad - n) * s), (0, 0)))

    # Block-diagonal mean matrix (constant-folded under jit), resident input.
    pool = jnp.kron(jnp.eye(tb, dtype=jnp.float32),
                    jnp.full((1, s), 1.0 / s, jnp.float32))    # [tb, tb*s]

    cost = pl.CostEstimate(
        flops=2 * npad * s * k * c + 2 * npad * c * op + 2 * npad * tb * s * c,
        transcendentals=0,
        bytes_accessed=(npad * s * k * 2 + k * c * 2 + c * 4
                        + tb * tb * s * 4 + c * op * 2 + op * 4
                        + npad * op * 4),
    )

    out = pl.pallas_call(
        _conv3_pool_fc_kernel,
        out_shape=jax.ShapeDtypeStruct((npad, op), jnp.float32),
        grid=(npad // tb,),
        in_specs=[
            pl.BlockSpec((tb * s, k), lambda i: (i, 0)),   # patches, per tile
            pl.BlockSpec((k, c), lambda i: (0, 0)),        # conv3 weight
            pl.BlockSpec((1, c), lambda i: (0, 0)),        # conv3 bias
            pl.BlockSpec((tb, tb * s), lambda i: (0, 0)),  # pooling matrix
            pl.BlockSpec((c, op), lambda i: (0, 0)),       # FC weight (padded)
            pl.BlockSpec((1, op), lambda i: (0, 0)),       # FC bias (padded)
        ],
        out_specs=pl.BlockSpec((tb, op), lambda i: (i, 0)),
        compiler_params=pltpu.CompilerParams(
            dimension_semantics=("parallel",),
            vmem_limit_bytes=_VMEM_LIMIT,
        ),
        cost_estimate=cost,
    )(patches.astype(jnp.bfloat16), w3, b3, pool, wfc_p, bfc_p)
    return out[:n]


# ----------------------------------------------------------------------------
# Glue: im2col in NHWC (channels-last, no transposes) — layout plumbing only
# ----------------------------------------------------------------------------
def im2col_nhwc(x, kh=4, kw=4, stride=2, pad=1):
    """x: [N, H, W, C] -> ([N*OH*OW, kh*kw*C], OH, OW).

    Column order is (kh, kw, cin) with channels on the fast (lane) axis; the
    matching weight layout is w.transpose(KH, KW, Cin, Cout).reshape(-1, Cout).
    """
    N, H, W, C = x.shape
    OH = (H + 2 * pad - kh) // stride + 1
    OW = (W + 2 * pad - kw) // stride + 1
    xp = jnp.pad(x, ((0, 0), (pad, pad), (pad, pad), (0, 0)))
    cols = []
    for i in range(kh):
        for j in range(kw):
            cols.append(xp[:, i:i + stride * OH:stride,
                           j:j + stride * OW:stride, :])
    patches = jnp.concatenate(cols, axis=-1)          # [N, OH, OW, kh*kw*C]
    return patches.reshape(N * OH * OW, kh * kw * C), OH, OW


# ----------------------------------------------------------------------------
# Parameter init (PyTorch layouts) + one-time kernel-layout preparation
# ----------------------------------------------------------------------------
def init_params(key, input_channels=1, num_classes=2):
    ks = jax.random.split(key, 8)

    def conv_w(k, cout, cin):
        return 0.05 * jax.random.normal(k, (cout, cin, 4, 4), jnp.float32)

    return {
        "w1": conv_w(ks[0], 64, input_channels),
        "b1": 0.01 * jax.random.normal(ks[1], (64,), jnp.float32),
        "w2": conv_w(ks[2], 128, 64),
        "b2": 0.01 * jax.random.normal(ks[3], (128,), jnp.float32),
        "w3": conv_w(ks[4], 256, 128),
        "b3": 0.01 * jax.random.normal(ks[5], (256,), jnp.float32),
        # Linear: PyTorch weight is [num_classes, 256]; stored transposed.
        "wfc": 0.05 * jax.random.normal(ks[6], (256, num_classes), jnp.float32),
        "bfc": 0.01 * jax.random.normal(ks[7], (num_classes,), jnp.float32),
    }


def prepare_params(params):
    """One-time conversion to kernel layouts (hoisted out of the forward)."""
    def conv_w2d(w):  # [Cout, Cin, KH, KW] -> [KH*KW*Cin, Cout] bf16
        cout, cin, kh, kw = w.shape
        return (jnp.transpose(w, (2, 3, 1, 0))
                .reshape(kh * kw * cin, cout).astype(jnp.bfloat16))

    c, o = params["wfc"].shape
    op = _round_up(o, 128)                       # lane-dense class dim
    wfc_p = (jnp.zeros((c, op), jnp.bfloat16)
             .at[:, :o].set(params["wfc"].astype(jnp.bfloat16)))
    bfc_p = (jnp.zeros((1, op), jnp.float32)
             .at[:, :o].set(params["bfc"].reshape(1, o).astype(jnp.float32)))
    return {
        "w1": conv_w2d(params["w1"]),
        "b1": params["b1"].reshape(1, -1).astype(jnp.float32),
        "w2": conv_w2d(params["w2"]),
        "b2": params["b2"].reshape(1, -1).astype(jnp.float32),
        "w3": conv_w2d(params["w3"]),
        "b3": params["b3"].reshape(1, -1).astype(jnp.float32),
        "wfc": wfc_p,
        "bfc": bfc_p,
    }


# ----------------------------------------------------------------------------
# Forward pass
# ----------------------------------------------------------------------------
@functools.partial(jax.jit, static_argnums=2)
def classifier_forward(prepared, x, num_classes):
    """x: [N, C, H, W] (NCHW, like PyTorch). Returns logits [N, num_classes]."""
    n = x.shape[0]
    # Single NCHW -> NHWC transpose; everything downstream is channels-last.
    h = jnp.transpose(x, (0, 2, 3, 1)).astype(jnp.bfloat16)

    # conv1 + ReLU   (K = Cin*16 stays unpadded: full-dim block is legal)
    p1, oh1, ow1 = im2col_nhwc(h)
    h = matmul_bias_relu(p1, prepared["w1"], prepared["b1"])
    h = h.reshape(n, oh1, ow1, -1)                             # NHWC, no transpose

    # conv2 + ReLU
    p2, oh2, ow2 = im2col_nhwc(h)
    h = matmul_bias_relu(p2, prepared["w2"], prepared["b2"])
    h = h.reshape(n, oh2, ow2, -1)

    # conv3 + ReLU + AdaptiveAvgPool2d((1,1)) + Linear, fused in one kernel.
    p3, oh3, ow3 = im2col_nhwc(h)
    logits = conv3_pool_fc(p3, oh3 * ow3, prepared["w3"], prepared["b3"],
                           prepared["wfc"], prepared["bfc"])
    return logits[:, :num_classes]


# Pure-JAX reference (f32, lax.conv) for a loose numerical sanity check.
def _reference_forward(params, x):
    def conv(h, w, b):
        out = jax.lax.conv_general_dilated(
            h, w, window_strides=(2, 2), padding=((1, 1), (1, 1)),
            dimension_numbers=("NCHW", "OIHW", "NCHW"))
        return jax.nn.relu(out + b.reshape(1, -1, 1, 1))

    h = conv(x, params["w1"], params["b1"])
    h = conv(h, params["w2"], params["b2"])
    h = conv(h, params["w3"], params["b3"])
    feat = jnp.mean(h, axis=(2, 3))
    return feat @ params["wfc"] + params["bfc"]


# ----------------------------------------------------------------------------
if __name__ == "__main__":
    key = jax.random.PRNGKey(0)
    pkey, xkey = jax.random.split(key)

    input_channels = 1
    num_classes = 2
    params = init_params(pkey, input_channels, num_classes)
    prepared = prepare_params(params)            # one-time weight preparation

    # Small input consistent with the module: batch=2, NCHW, 16x16 spatial.
    x = jax.random.normal(xkey, (2, input_channels, 16, 16), jnp.float32)

    logits = classifier_forward(prepared, x, num_classes)
    logits = jax.block_until_ready(logits)

    assert logits.shape == (2, num_classes)
    assert bool(jnp.all(jnp.isfinite(logits)))

    # Loose tolerance: kernel path uses bf16 activations/weights w/ f32 accum.
    ref = _reference_forward(params, x)
    assert float(jnp.max(jnp.abs(logits - ref))) < 5e-2

    print("KERNEL_OK")
</pallas_src>

<mosaic_0001>
module attributes {stable_mosaic.version = 11 : i64} {
  func.func @_mm_bias_relu_kernel(%arg0: i32, %arg1: memref<64x16xbf16, #tpu.memory_space<vmem>>, %arg2: memref<16x64xbf16, #tpu.memory_space<vmem>>, %arg3: memref<1x64xf32, #tpu.memory_space<vmem>>, %arg4: memref<64x64xbf16, #tpu.memory_space<vmem>>) attributes {dimension_semantics = [#tpu.dimension_semantics<parallel>], iteration_bounds = array<i64: 2>, scalar_prefetch = 0 : i64, scratch_operands = 0 : i64, tpu.core_type = #tpu.core_type<tc>, window_params = [{transform_indices = @transform_0, window_bounds = array<i64: 64, 16>}, {pipeline_mode = #tpu.pipeline_mode<synchronous>, transform_indices = @transform_1, window_bounds = array<i64: 16, 64>}, {pipeline_mode = #tpu.pipeline_mode<synchronous>, transform_indices = @transform_2, window_bounds = array<i64: 1, 64>}, {transform_indices = @transform_3, window_bounds = array<i64: 64, 64>}]} {
    %c0 = arith.constant 0 : index
    %c0_0 = arith.constant 0 : index
    %0 = vector.load %arg1[%c0, %c0_0] : memref<64x16xbf16, #tpu.memory_space<vmem>>, vector<64x16xbf16>
    %c0_1 = arith.constant 0 : index
    %c0_2 = arith.constant 0 : index
    %1 = vector.load %arg2[%c0_1, %c0_2] : memref<16x64xbf16, #tpu.memory_space<vmem>>, vector<16x64xbf16>
    %cst = arith.constant dense<0.000000e+00> : vector<64x64xf32>
    %2 = tpu.matmul %0, %1, %cst {dimension_numbers = #tpu.dot_dimension_numbers<[1], [0], [0], [1], [0, 0, 1, 1], [], []>} : vector<64x16xbf16>, vector<16x64xbf16>, vector<64x64xf32> -> vector<64x64xf32>
    %c0_3 = arith.constant 0 : index
    %c0_4 = arith.constant 0 : index
    %3 = vector.load %arg3[%c0_3, %c0_4] : memref<1x64xf32, #tpu.memory_space<vmem>>, vector<1x64xf32>
    %4 = vector.broadcast %3 : vector<1x64xf32> to vector<64x64xf32>
    %5 = arith.addf %2, %4 : vector<64x64xf32>
    %cst_5 = arith.constant 0.000000e+00 : f32
    %6 = vector.broadcast %cst_5 : f32 to vector<64x64xf32>
    %7 = arith.maximumf %5, %6 : vector<64x64xf32>
    %8 = arith.truncf %7 : vector<64x64xf32> to vector<64x64xbf16>
    %c0_6 = arith.constant 0 : index
    %c0_7 = arith.constant 0 : index
    %9 = vector.load %arg4[%c0_6, %c0_7] : memref<64x64xbf16, #tpu.memory_space<vmem>>, vector<64x64xbf16>
    tpu.vector_store %arg4[%c0_6, %c0_7], %8 {strides = array<i32>} : memref<64x64xbf16, #tpu.memory_space<vmem>>, vector<64x64xbf16>,
    return
  }
  func.func @transform_0(%arg0: i32) -> (i32, i32) {
    %c0_i32 = arith.constant 0 : i32
    %c0_i32_0 = arith.constant 0 : i32
    return %arg0, %c0_i32 : i32, i32
  }
  func.func @transform_1(%arg0: i32) -> (i32, i32) {
    %c0_i32 = arith.constant 0 : i32
    %c0_i32_0 = arith.constant 0 : i32
    %c0_i32_1 = arith.constant 0 : i32
    return %c0_i32, %c0_i32_0 : i32, i32
  }
  func.func @transform_2(%arg0: i32) -> (i32, i32) {
    %c0_i32 = arith.constant 0 : i32
    %c0_i32_0 = arith.constant 0 : i32
    %c0_i32_1 = arith.constant 0 : i32
    return %c0_i32, %c0_i32_0 : i32, i32
  }
  func.func @transform_3(%arg0: i32) -> (i32, i32) {
    %c0_i32 = arith.constant 0 : i32
    %c0_i32_0 = arith.constant 0 : i32
    return %arg0, %c0_i32 : i32, i32
  }
}

module attributes {stable_mosaic.version = 11 : i64} {
  func.func @_mm_bias_relu_kernel(%arg0: i32, %arg1: memref<16x1024xbf16, #tpu.memory_space<vmem>>, %arg2: memref<1024x128xbf16, #tpu.memory_space<vmem>>, %arg3: memref<1x128xf32, #tpu.memory_space<vmem>>, %arg4: memref<16x128xbf16, #tpu.memory_space<vmem>>) attributes {dimension_semantics = [#tpu.dimension_semantics<parallel>], iteration_bounds = array<i64: 2>, scalar_prefetch = 0 : i64, scratch_operands = 0 : i64, tpu.core_type = #tpu.core_type<tc>, window_params = [{transform_indices = @transform_0, window_bounds = array<i64: 16, 1024>}, {pipeline_mode = #tpu.pipeline_mode<synchronous>, transform_indices = @transform_1, window_bounds = array<i64: 1024, 128>}, {pipeline_mode = #tpu.pipeline_mode<synchronous>, transform_indices = @transform_2, window_bounds = array<i64: 1, 128>}, {transform_indices = @transform_3, window_bounds = array<i64: 16, 128>}]} {
    %c0 = arith.constant 0 : index
    %c0_0 = arith.constant 0 : index
    %0 = vector.load %arg1[%c0, %c0_0] : memref<16x1024xbf16, #tpu.memory_space<vmem>>, vector<16x1024xbf16>
    %c0_1 = arith.constant 0 : index
    %c0_2 = arith.constant 0 : index
    %1 = vector.load %arg2[%c0_1, %c0_2] : memref<1024x128xbf16, #tpu.memory_space<vmem>>, vector<1024x128xbf16>
    %cst = arith.constant dense<0.000000e+00> : vector<16x128xf32>
    %2 = tpu.matmul %0, %1, %cst {dimension_numbers = #tpu.dot_dimension_numbers<[1], [0], [0], [1], [0, 0, 1, 1], [], []>} : vector<16x1024xbf16>, vector<1024x128xbf16>, vector<16x128xf32> -> vector<16x128xf32>
    %c0_3 = arith.constant 0 : index
    %c0_4 = arith.constant 0 : index
    %3 = vector.load %arg3[%c0_3, %c0_4] : memref<1x128xf32, #tpu.memory_space<vmem>>, vector<1x128xf32>
    %4 = vector.broadcast %3 : vector<1x128xf32> to vector<16x128xf32>
    %5 = arith.addf %2, %4 : vector<16x128xf32>
    %cst_5 = arith.constant 0.000000e+00 : f32
    %6 = vector.broadcast %cst_5 : f32 to vector<16x128xf32>
    %7 = arith.maximumf %5, %6 : vector<16x128xf32>
    %8 = arith.truncf %7 : vector<16x128xf32> to vector<16x128xbf16>
    %c0_6 = arith.constant 0 : index
    %c0_7 = arith.constant 0 : index
    %9 = vector.load %arg4[%c0_6, %c0_7] : memref<16x128xbf16, #tpu.memory_space<vmem>>, vector<16x128xbf16>
    tpu.vector_store %arg4[%c0_6, %c0_7], %8 {strides = array<i32>} : memref<16x128xbf16, #tpu.memory_space<vmem>>, vector<16x128xbf16>,
    return
  }
  func.func @transform_0(%arg0: i32) -> (i32, i32) {
    %c0_i32 = arith.constant 0 : i32
    %c0_i32_0 = arith.constant 0 : i32
    return %arg0, %c0_i32 : i32, i32
  }
  func.func @transform_1(%arg0: i32) -> (i32, i32) {
    %c0_i32 = arith.constant 0 : i32
    %c0_i32_0 = arith.constant 0 : i32
    %c0_i32_1 = arith.constant 0 : i32
    return %c0_i32, %c0_i32_0 : i32, i32
  }
  func.func @transform_2(%arg0: i32) -> (i32, i32) {
    %c0_i32 = arith.constant 0 : i32
    %c0_i32_0 = arith.constant 0 : i32
    %c0_i32_1 = arith.constant 0 : i32
    return %c0_i32, %c0_i32_0 : i32, i32
  }
  func.func @transform_3(%arg0: i32) -> (i32, i32) {
    %c0_i32 = arith.constant 0 : i32
    %c0_i32_0 = arith.constant 0 : i32
    return %arg0, %c0_i32 : i32, i32
  }
}

module attributes {stable_mosaic.version = 11 : i64} {
  func.func @_conv3_pool_fc_kernel(%arg0: i32, %arg1: memref<8x2048xbf16, #tpu.memory_space<vmem>>, %arg2: memref<2048x256xbf16, #tpu.memory_space<vmem>>, %arg3: memref<1x256xf32, #tpu.memory_space<vmem>>, %arg4: memref<2x8xf32, #tpu.memory_space<vmem>>, %arg5: memref<256x128xbf16, #tpu.memory_space<vmem>>, %arg6: memref<1x128xf32, #tpu.memory_space<vmem>>, %arg7: memref<2x128xf32, #tpu.memory_space<vmem>>) attributes {dimension_semantics = [#tpu.dimension_semantics<parallel>], iteration_bounds = array<i64: 1>, scalar_prefetch = 0 : i64, scratch_operands = 0 : i64, tpu.core_type = #tpu.core_type<tc>, window_params = [{transform_indices = @transform_0, window_bounds = array<i64: 8, 2048>}, {pipeline_mode = #tpu.pipeline_mode<synchronous>, transform_indices = @transform_1, window_bounds = array<i64: 2048, 256>}, {pipeline_mode = #tpu.pipeline_mode<synchronous>, transform_indices = @transform_2, window_bounds = array<i64: 1, 256>}, {pipeline_mode = #tpu.pipeline_mode<synchronous>, transform_indices = @transform_3, window_bounds = array<i64: 2, 8>}, {pipeline_mode = #tpu.pipeline_mode<synchronous>, transform_indices = @transform_4, window_bounds = array<i64: 256, 128>}, {pipeline_mode = #tpu.pipeline_mode<synchronous>, transform_indices = @transform_5, window_bounds = array<i64: 1, 128>}, {transform_indices = @transform_6, window_bounds = array<i64: 2, 128>}]} {
    %c0 = arith.constant 0 : index
    %c0_0 = arith.constant 0 : index
    %0 = vector.load %arg1[%c0, %c0_0] : memref<8x2048xbf16, #tpu.memory_space<vmem>>, vector<8x2048xbf16>
    %c0_1 = arith.constant 0 : index
    %c0_2 = arith.constant 0 : index
    %1 = vector.load %arg2[%c0_1, %c0_2] : memref<2048x256xbf16, #tpu.memory_space<vmem>>, vector<2048x256xbf16>
    %cst = arith.constant dense<0.000000e+00> : vector<8x256xf32>
    %2 = tpu.matmul %0, %1, %cst {dimension_numbers = #tpu.dot_dimension_numbers<[1], [0], [0], [1], [0, 0, 1, 1], [], []>} : vector<8x2048xbf16>, vector<2048x256xbf16>, vector<8x256xf32> -> vector<8x256xf32>
    %c0_3 = arith.constant 0 : index
    %c0_4 = arith.constant 0 : index
    %3 = vector.load %arg3[%c0_3, %c0_4] : memref<1x256xf32, #tpu.memory_space<vmem>>, vector<1x256xf32>
    %4 = vector.broadcast %3 : vector<1x256xf32> to vector<8x256xf32>
    %5 = arith.addf %2, %4 : vector<8x256xf32>
    %cst_5 = arith.constant 0.000000e+00 : f32
    %6 = vector.broadcast %cst_5 : f32 to vector<8x256xf32>
    %7 = arith.maximumf %5, %6 : vector<8x256xf32>
    %c0_6 = arith.constant 0 : index
    %c0_7 = arith.constant 0 : index
    %8 = vector.load %arg4[%c0_6, %c0_7] : memref<2x8xf32, #tpu.memory_space<vmem>>, vector<2x8xf32>
    %cst_8 = arith.constant dense<0.000000e+00> : vector<2x256xf32>
    %9 = tpu.matmul %8, %7, %cst_8 {dimension_numbers = #tpu.dot_dimension_numbers<[1], [0], [0], [1], [0, 0, 1, 1], [], []>} : vector<2x8xf32>, vector<8x256xf32>, vector<2x256xf32> -> vector<2x256xf32>
    %10 = arith.truncf %9 : vector<2x256xf32> to vector<2x256xbf16>
    %c0_9 = arith.constant 0 : index
    %c0_10 = arith.constant 0 : index
    %11 = vector.load %arg5[%c0_9, %c0_10] : memref<256x128xbf16, #tpu.memory_space<vmem>>, vector<256x128xbf16>
    %cst_11 = arith.constant dense<0.000000e+00> : vector<2x128xf32>
    %12 = tpu.matmul %10, %11, %cst_11 {dimension_numbers = #tpu.dot_dimension_numbers<[1], [0], [0], [1], [0, 0, 1, 1], [], []>} : vector<2x256xbf16>, vector<256x128xbf16>, vector<2x128xf32> -> vector<2x128xf32>
    %c0_12 = arith.constant 0 : index
    %c0_13 = arith.constant 0 : index
    %13 = vector.load %arg6[%c0_12, %c0_13] : memref<1x128xf32, #tpu.memory_space<vmem>>, vector<1x128xf32>
    %14 = vector.broadcast %13 : vector<1x128xf32> to vector<2x128xf32>
    %15 = arith.addf %12, %14 : vector<2x128xf32>
    %c0_14 = arith.constant 0 : index
    %c0_15 = arith.constant 0 : index
    %16 = vector.load %arg7[%c0_14, %c0_15] : memref<2x128xf32, #tpu.memory_space<vmem>>, vector<2x128xf32>
    tpu.vector_store %arg7[%c0_14, %c0_15], %15 {strides = array<i32>} : memref<2x128xf32, #tpu.memory_space<vmem>>, vector<2x128xf32>,
    return
  }
  func.func @transform_0(%arg0: i32) -> (i32, i32) {
    %c0_i32 = arith.constant 0 : i32
    %c0_i32_0 = arith.constant 0 : i32
    return %arg0, %c0_i32 : i32, i32
  }
  func.func @transform_1(%arg0: i32) -> (i32, i32) {
    %c0_i32 = arith.constant 0 : i32
    %c0_i32_0 = arith.constant 0 : i32
    %c0_i32_1 = arith.constant 0 : i32
    return %c0_i32, %c0_i32_0 : i32, i32
  }
  func.func @transform_2(%arg0: i32) -> (i32, i32) {
    %c0_i32 = arith.constant 0 : i32
    %c0_i32_0 = arith.constant 0 : i32
    %c0_i32_1 = arith.constant 0 : i32
    return %c0_i32, %c0_i32_0 : i32, i32
  }
  func.func @transform_3(%arg0: i32) -> (i32, i32) {
    %c0_i32 = arith.constant 0 : i32
    %c0_i32_0 = arith.constant 0 : i32
    %c0_i32_1 = arith.constant 0 : i32
    return %c0_i32, %c0_i32_0 : i32, i32
  }
  func.func @transform_4(%arg0: i32) -> (i32, i32) {
    %c0_i32 = arith.constant 0 : i32
    %c0_i32_0 = arith.constant 0 : i32
    %c0_i32_1 = arith.constant 0 : i32
    return %c0_i32, %c0_i32_0 : i32, i32
  }
  func.func @transform_5(%arg0: i32) -> (i32, i32) {
    %c0_i32 = arith.constant 0 : i32
    %c0_i32_0 = arith.constant 0 : i32
    %c0_i32_1 = arith.constant 0 : i32
    return %c0_i32, %c0_i32_0 : i32, i32
  }
  func.func @transform_6(%arg0: i32) -> (i32, i32) {
    %c0_i32 = arith.constant 0 : i32
    %c0_i32_0 = arith.constant 0 : i32
    return %arg0, %c0_i32 : i32, i32
  }
}

</mosaic_0001>

<bundles_post_ra>
// kernel: classifier_forward.3
= control target key start
LH: loop header
LB: loop body
LE: loop exit
PB: predicated region body
PF: predicated region fallthrough
CT: control target
= control target key end

     0   :  { %s496_s12 = smov 0   ;;  %s537_s0 = inlined_call_operand.vmem [shape: bf16[128,16], index: 0, kind: input, shape index: {}]   ;;  %s538_s1 = inlined_call_operand.vmem [shape: bf16[16,64], index: 1, kind: input, shape index: {}]   ;;  %s539_s2 = inlined_call_operand.vmem [shape: f32[1,64], index: 2, kind: input, shape index: {}]   ;;  %s540_s3 = inlined_call_operand.vmem [shape: bf16[128,64], index: 3, kind: output, shape index: {}]  }
   0x1 LB: > { %s401_s13 = sadd.s32 4294967295, %s474_s12   ;;  %p405_p0 = scmp.ge.s32.totalorder %s474_s12, 1  ;;  %s474_s12 = sphi %s496_s12, %s13_s12  }
   0x2   : > { %p138_p1 = scmp.lt.s32.totalorder %s474_s12, 3 }
   0x4   : > { %p139_p2 = pnand %p405_p0, %p138_p1 }
   0x5   : > { %s406_s16 = sshll.u32 (!%p139_p2), %s401_s13, 3 }
   0x6   : > { %142 = sbr.rel (%p139_p2) target bundleno = 222 (0xde), region = 32  ;;  %p163_p3 = scmp.lt.s32.totalorder (!%p139_p2), %s406_s16, 15 }
   0xb   : > { %v463_v0 = vld [vmem:[%s538_s1] sm:$0xff]   ;;  %s542_s16 = smov (!%p163_p3, %s406_s16), 15  ;;  %vm218_vm0 = vcmask 130048   ;;  %vm336_vm1 = vcmask 519168  }
   0xc   : > { %443 = vmatprep.subr.bf16.mxu0 %v463_v0  ;;  %453 = vmatprep.subr.bf16.mxu1 %v463_v0  ;;  %s407_s17 = sshll.u32 %s542_s16, 2  ;;  %v410_v5 = vld [vmem:[%s539_s2] ss:$0 sm:$0xff] }
   0xd   : > { %444 = vmatpush3.bf16.msra.mxu0 %v463_v0  ;;  %454 = vmatpush3.bf16.msra.mxu1 %v463_v0  ;;  %s166_s20 = scalar_lea.vmem %s537_s0, %s407_s17  ;;  %s516_s25 = scalar_lea.vmem %s540_s3, %s407_s17 }
   0xe   : > { %v464_v1 = vld [vmem:[%s166_s20] sm:$0xff]   ;;  %v465_v2 = vld [vmem:[%s166_s20 + $0x10] sm:$0xff]   ;;  %v466_v3 = vld [vmem:[%s166_s20 + $0x8] sm:$0xff]  }
   0xf   : > { %445 = vmatprep.mubr.msk.bf16.mxu0 %vm218_vm0, %v464_v1  ;;  %449 = vmatprep.mubr.msk.bf16.mxu1 %vm218_vm0, %v465_v2  ;;  %v467_v4 = vld [vmem:[%s166_s20 + $0x18] sm:$0xff]  }
  0x10   : > { %446 = vmatmul.mubr.msk.bf16.vlgmr.msra.gmra.mxu0 %vm218_vm0, %v466_v3  ;;  %450 = vmatmul.mubr.msk.bf16.vlgmr.msra.gmra.mxu1 %vm218_vm0, %v467_v4 }
  0xd0   : > { %v447_v6 = vpop.f32.mrf.mxu0  ;;  %v451_v8 = vpop.f32.mrf.mxu1 }
  0xd1   : > { %v274_v7 = vadd.f32 %v447_v6, %v410_v5  ;;  %v290_v9 = vadd.f32 %v451_v8, %v410_v5 }
  0xd2   : > { %v265_v10 = vpop.f32.mrf.mxu0  ;;  %v281_v13 = vpop.f32.mrf.mxu1 }
  0xd3   : > { %v298_v11 = vmax.f32 %v274_v7, 0.0  ;;  %v266_v12 = vadd.f32 %v410_v5, %v265_v10  ;;  %v302_v14 = vmax.f32 %v290_v9, 0.0  ;;  %v282_v15 = vadd.f32 %v410_v5, %v281_v13 }
  0xd4   : > { %v448_v16 = vpop.f32.mrf.mxu0  ;;  %v452_v20 = vpop.f32.mrf.mxu1 }
  0xd5   : > { %v432_v17 = vpack.c.bf16 %v298_v11, %v298_v11  ;;  %v296_v18 = vmax.f32 %v266_v12, 0.0  ;;  %v277_v19 = vadd.f32 %v448_v16, %v410_v5  ;;  %v436_v21 = vpack.c.bf16 %v302_v14, %v302_v14 }
  0xd6   : > { %v300_v22 = vmax.f32 %v282_v15, 0.0  ;;  %v293_v23 = vadd.f32 %v452_v20, %v410_v5  ;;  %v268_v24 = vpop.f32.mrf.mxu0  ;;  %v284_v28 = vpop.f32.mrf.mxu1 }
  0xd7   : > { %339 = vst.msk [vmem:[%s516_s25 + $0x8] sm:$0xf] %vm336_vm1, %v432_v17  ;;  %v430_v25 = vpack.c.bf16 %v296_v18, %v296_v18  ;;  %v299_v26 = vmax.f32 %v277_v19, 0.0  ;;  %v269_v27 = vadd.f32 %v410_v5, %v268_v24  ;;  %343 = vst.msk [vmem:[%s516_s25 + $0x18] sm:$0xf] %vm336_vm1, %v436_v21  ;;  %v285_v31 = vadd.f32 %v410_v5, %v284_v28 }
  0xd8   : > { %v434_v29 = vpack.c.bf16 %v300_v22, %v300_v22  ;;  %v303_v30 = vmax.f32 %v293_v23, 0.0 }
  0xd9   : > { %337 = vst.msk [vmem:[%s516_s25] sm:$0xf] %vm336_vm1, %v430_v25  ;;  %v433_v32 = vpack.c.bf16 %v299_v26, %v299_v26  ;;  %v297_v33 = vmax.f32 %v269_v27, 0.0  ;;  %v301_v35 = vmax.f32 %v285_v31, 0.0 }
  0xda   : > { %341 = vst.msk [vmem:[%s516_s25 + $0x10] sm:$0xf] %vm336_vm1, %v434_v29  ;;  %v437_v34 = vpack.c.bf16 %v303_v30, %v303_v30 }
  0xdb   : > { %340 = vst.msk [vmem:[%s516_s25 + $0xc] sm:$0xf] %vm336_vm1, %v433_v32  ;;  %v431_v36 = vpack.c.bf16 %v297_v33, %v297_v33  ;;  %v435_v37 = vpack.c.bf16 %v301_v35, %v301_v35 }
  0xdc   : > { %344 = vst.msk [vmem:[%s516_s25 + $0x1c] sm:$0xf] %vm336_vm1, %v437_v34 }
  0xdd   : > { %338 = vst.msk [vmem:[%s516_s25 + $0x4] sm:$0xf] %vm336_vm1, %v431_v36  ;;  %342 = vst.msk [vmem:[%s516_s25 + $0x14] sm:$0xf] %vm336_vm1, %v435_v37 }
  0xde PF: > { %s13_s12 = sadd.s32 1, %s474_s12  }
  0xdf   : > { %p10_p4 = scmp.ge.s32.totalorder %s13_s12, 4  }
  0xe1   :  { %12 = sbr.rel (!%p10_p4) target bundleno = 1 (0x1), region = 62 }

// kernel: classifier_forward.4
= control target key start
LH: loop header
LB: loop body
LE: loop exit
PB: predicated region body
PF: predicated region fallthrough
CT: control target
= control target key end

     0   :  { %8 = vsyncpa [#allocation3], 0  ;;  %s1335_s12 = smov 0   ;;  %s1394_s0 = inlined_call_operand.vmem [shape: bf16[32,1024], index: 0, kind: input, shape index: {}]   ;;  %s1395_s1 = inlined_call_operand.hbm [shape: bf16[1024,128], index: 1, kind: input, shape index: {}]   ;;  %s1396_s2 = inlined_call_operand.vmem [shape: f32[1,128], index: 2, kind: input, shape index: {}]   ;;  %s1397_s3 = inlined_call_operand.vmem [shape: bf16[32,128], index: 3, kind: output, shape index: {}]  }
   0x1 LB: > { %s1004_s13 = sadd.s32 4294967295, %s1310_s12   ;;  %p1006_p0 = scmp.ge.s32.totalorder %s1310_s12, 1  ;;  %s1310_s12 = sphi %s1335_s12, %s14_s12  }
   0x2   : > { %p113_p1 = scmp.lt.s32.totalorder %s1310_s12, 3  ;;  %s1312_s14 = smov [#allocation2]  }
   0x3   : > { %s125_s15 = sshll.u32 %s1312_s14, 4  ;;  %p1349_p3 = scmp.eq.s32.totalorder %s1004_s13, 0  ;;  %s126_s15 = int_to_ptr.vmem [resolvable:$true] %s125_s15 }
   0x4   : > { %p1343_p2 = pnand %p1006_p0, %p113_p1  ;;  %s1285_s18 = scalar_lea.vmem %s126_s15, 8192 }
   0x5   : > { %p1286_p7 = scmp.ne.s32.totalorder %s126_s15, %s1285_s18  ;;  %p1293_p10 = scmp.lt.s32.totalorder %s126_s15, %s126_s15 }
   0x6   : > { %p1193_p4 = pneg %p1343_p2  ;;  %p1294_p11 = scmp.lt.s32.totalorder %s1285_s18, %s1285_s18 }
   0x8   : > { %p1194_p5 = pnand %p1349_p3, %p1193_p4  ;;  %p1295_p12 = por %p1294_p11, %p1293_p10 }
   0xa   : > { %p1276_p6 = pneg %p1194_p5 }
   0xc   : > { %p1288_p8 = pnand %p1286_p7, %p1276_p6 }
   0xe   : > { %p1289_p9 = pneg %p1288_p8 }
  0x10   : > { %p1296_p13 = pnand %p1295_p12, %p1289_p9 }
  0x12   : > { %1299 = shalt.err (!%p1296_p13)
}
  0x13   : > { %s1313_s19 = smov 64   ;;  %s1314_s20 = smov 4  }
  0x14   : > { %1196 = dma.hbm_to_vmem [thread:$0]  (!%p1194_p5), %s1395_s1, 8192, %s126_s15, [#allocation3], %s1313_s19, %s1313_s19, %s1314_s20  }
  0x15   : > { %154 = sbr.rel (%p1343_p2) target bundleno = 303 (0x12f), region = 32 }
  0x1a   : > { %1305 = dma.done.wait (%p1349_p3), [#allocation3], 8192  }
  0x1b   : > { %1307 = vsyncadd (%p1349_p3), [#allocation3], 4294959104  ;;  %v1210_v0 = vld [vmem:[#allocation2 + $0x78] sm:$0xff]   ;;  %v1214_v4 = vld [vmem:[#allocation2 + $0x70] sm:$0xff]   ;;  %s1011_s23 = sshll.u32 %s1004_s13, 1 }
  0x1c   : > { %v1211_v1 = vld [vmem:[#allocation2 + $0xf8] sm:$0xff]   ;;  %1101 = vmatprep.subr.bf16.mxu0 %v1210_v0  ;;  %v1215_v5 = vld [vmem:[#allocation2 + $0xf0] sm:$0xff]   ;;  %v1218_v8 = vld [vmem:[#allocation2 + $0x68] sm:$0xff]   ;;  %p180_p0 = scmp.lt.s32.totalorder %s1011_s23, 3 }
  0x1d   : > { %v1212_v2 = vld [vmem:[#allocation2 + $0x38] sm:$0xff]   ;;  %1123 = vmatprep.subr.bf16.mxu1 %v1211_v1  ;;  %v1216_v6 = vld [vmem:[#allocation2 + $0x30] sm:$0xff]   ;;  %v1219_v9 = vld [vmem:[#allocation2 + $0xe8] sm:$0xff]  }
  0x1e   : > { %v1213_v3 = vld [vmem:[#allocation2 + $0xb8] sm:$0xff]   ;;  %1102 = vmatpush3.bf16.msra.mxu0 %v1212_v2  ;;  %v1217_v7 = vld [vmem:[#allocation2 + $0xb0] sm:$0xff]   ;;  %v1220_v10 = vld [vmem:[#allocation2 + $0x28] sm:$0xff]   ;;  %s1401_s23 = smov (!%p180_p0, %s1011_s23), 3 }
  0x1f   : > { %1124 = vmatpush3.bf16.msra.mxu1 %v1213_v3  ;;  %1103 = vmatprep.subr.bf16.mxu0 %v1214_v4  ;;  %v1221_v11 = vld [vmem:[#allocation2 + $0xa8] sm:$0xff]   ;;  %v1222_v12 = vld [vmem:[#allocation2 + $0x60] sm:$0xff]   ;;  %v1226_v16 = vld [vmem:[#allocation2 + $0x58] sm:$0xff]   ;;  %s1093_s24 = sshll.u32 %s1401_s23, 5  ;;  %s1015_s30 = sshll.u32 %s1401_s23, 2 }
  0x20   : > { %1125 = vmatprep.subr.bf16.mxu1 %v1215_v5  ;;  %v1223_v13 = vld [vmem:[#allocation2 + $0xe0] sm:$0xff]   ;;  %v1227_v17 = vld [vmem:[#allocation2 + $0xd8] sm:$0xff]   ;;  %v1230_v20 = vld [vmem:[#allocation2 + $0x50] sm:$0xff]   ;;  %s1374_s27 = scalar_lea.vmem %s1394_s0, %s1093_s24  ;;  %s190_s6 = scalar_lea.vmem %s1397_s3, %s1015_s30 }
  0x21   : > { %v1224_v14 = vld [vmem:[#allocation2 + $0x20] sm:$0xff]   ;;  %v1228_v18 = vld [vmem:[#allocation2 + $0x18] sm:$0xff]   ;;  %v1231_v21 = vld [vmem:[#allocation2 + $0xd0] sm:$0xff]  }
  0x22   : > { %1104 = vmatpush3.bf16.msra.mxu0 %v1216_v6  ;;  %v1225_v15 = vld [vmem:[#allocation2 + $0xa0] sm:$0xff]   ;;  %v1229_v19 = vld [vmem:[#allocation2 + $0x98] sm:$0xff]   ;;  %v1232_v22 = vld [vmem:[#allocation2 + $0x10] sm:$0xff]  }
  0x23   : > { %1126 = vmatpush3.bf16.msra.mxu1 %v1217_v7  ;;  %1105 = vmatprep.subr.bf16.mxu0 %v1218_v8  ;;  %v1233_v23 = vld [vmem:[#allocation2 + $0x90] sm:$0xff]   ;;  %v1234_v24 = vld [vmem:[#allocation2 + $0x48] sm:$0xff]   ;;  %v1238_v28 = vld [vmem:[#allocation2 + $0x40] sm:$0xff]  }
  0x24   : > { %1127 = vmatprep.subr.bf16.mxu1 %v1219_v9  ;;  %v1235_v25 = vld [vmem:[#allocation2 + $0xc8] sm:$0xff]   ;;  %v1239_v29 = vld [vmem:[#allocation2 + $0xc0] sm:$0xff]   ;;  %v1242_v40 = vld [vmem:[#allocation2 + $0x178] sm:$0xff]  }
  0x25   : > { %v1236_v26 = vld [vmem:[#allocation2 + $0x8] sm:$0xff]   ;;  %v1240_v30 = vld [vmem:[#allocation2] sm:$0xff]   ;;  %v1243_v41 = vld [vmem:[#allocation2 + $0x1f8] sm:$0xff]  }
  0x26   : > { %1106 = vmatpush3.bf16.msra.mxu0 %v1220_v10  ;;  %v1237_v27 = vld [vmem:[#allocation2 + $0x88] sm:$0xff]   ;;  %v1241_v31 = vld [vmem:[#allocation2 + $0x80] sm:$0xff]   ;;  %v1244_v42 = vld [vmem:[#allocation2 + $0x138] sm:$0xff]  }
  0x27   : > { %1128 = vmatpush3.bf16.msra.mxu1 %v1221_v11  ;;  %1107 = vmatprep.subr.bf16.mxu0 %v1222_v12  ;;  %v193_v32 = vld [vmem:[%s1374_s27] sm:$0xff]  ;;  %v194_v34 = vld [vmem:[%s1374_s27 + $0x8] sm:$0xff]  ;;  %v1245_v43 = vld [vmem:[#allocation2 + $0x1b8] sm:$0xff]  }
  0x28   : > { %1129 = vmatprep.subr.bf16.mxu1 %v1223_v13  ;;  %v197_v33 = vld [vmem:[%s1374_s27 + $0x20] sm:$0xff]  ;;  %v198_v37 = vld [vmem:[%s1374_s27 + $0x28] sm:$0xff]  ;;  %v1246_v44 = vld [vmem:[#allocation2 + $0x170] sm:$0xff]  }
  0x29   : > { %v1017_v35 = vcombine.low %v193_v32, %v197_v33  ;;  %v1018_v36 = vcombine.high %v193_v32, %v197_v33  ;;  %v1019_v38 = vcombine.low %v194_v34, %v198_v37  ;;  %v1020_v39 = vcombine.high %v194_v34, %v198_v37  ;;  %v1247_v45 = vld [vmem:[#allocation2 + $0x1f0] sm:$0xff]   ;;  %v1250_v48 = vld [vmem:[#allocation2 + $0x168] sm:$0xff]   ;;  %v1254_v52 = vld [vmem:[#allocation2 + $0x160] sm:$0xff]  }
  0x2a   : > { %1108 = vmatpush3.bf16.msra.mxu0 %v1224_v14  ;;  %v1248_v46 = vld [vmem:[#allocation2 + $0x130] sm:$0xff]   ;;  %v1251_v49 = vld [vmem:[#allocation2 + $0x1e8] sm:$0xff]   ;;  %v1255_v53 = vld [vmem:[#allocation2 + $0x1e0] sm:$0xff]  }
  0x2b   : > { %1130 = vmatpush3.bf16.msra.mxu1 %v1225_v15  ;;  %1109 = vmatprep.subr.bf16.mxu0 %v1226_v16  ;;  %v1249_v47 = vld [vmem:[#allocation2 + $0x1b0] sm:$0xff]   ;;  %v1252_v50 = vld [vmem:[#allocation2 + $0x128] sm:$0xff]   ;;  %v1256_v54 = vld [vmem:[#allocation2 + $0x120] sm:$0xff]  }
  0x2c   : > { %1131 = vmatprep.subr.bf16.mxu1 %v1227_v17  ;;  %792 = vmatprep.mubr.bf16.mxu0 %v1018_v36  ;;  %v1253_v51 = vld [vmem:[#allocation2 + $0x1a8] sm:$0xff]   ;;  %v1257_v55 = vld [vmem:[#allocation2 + $0x1a0] sm:$0xff]   ;;  %v1258_v56 = vld [vmem:[#allocation2 + $0x158] sm:$0xff]  }
  0x2d   : > { %833 = vmatprep.mubr.bf16.mxu1 %v1020_v39  ;;  %v1259_v57 = vld [vmem:[#allocation2 + $0x1d8] sm:$0xff]   ;;  %v1262_v60 = vld [vmem:[#allocation2 + $0x150] sm:$0xff]   ;;  %v1266_v0 = vld [vmem:[#allocation2 + $0x148] sm:$0xff]  }
  0x2e   : > { %1110 = vmatpush3.bf16.msra.mxu0 %v1228_v18  ;;  %v1260_v58 = vld [vmem:[#allocation2 + $0x118] sm:$0xff]   ;;  %v1263_v61 = vld [vmem:[#allocation2 + $0x1d0] sm:$0xff]   ;;  %v1267_v1 = vld [vmem:[#allocation2 + $0x1c8] sm:$0xff]  }
  0x2f   : > { %1132 = vmatpush3.bf16.msra.mxu1 %v1229_v19  ;;  %1111 = vmatprep.subr.bf16.mxu0 %v1230_v20  ;;  %v1261_v59 = vld [vmem:[#allocation2 + $0x198] sm:$0xff]   ;;  %v1264_v62 = vld [vmem:[#allocation2 + $0x110] sm:$0xff]   ;;  %v1268_v2 = vld [vmem:[#allocation2 + $0x108] sm:$0xff]  }
  0x30   : > { %1133 = vmatprep.subr.bf16.mxu1 %v1231_v21  ;;  %v1265_v63 = vld [vmem:[#allocation2 + $0x190] sm:$0xff]   ;;  %v1269_v3 = vld [vmem:[#allocation2 + $0x188] sm:$0xff]   ;;  %v1270_v4 = vld [vmem:[#allocation2 + $0x140] sm:$0xff]  }
  0x31   : > { %v1271_v5 = vld [vmem:[#allocation2 + $0x1c0] sm:$0xff]   ;;  %v195_v8 = vld [vmem:[%s1374_s27 + $0x10] sm:$0xff]  ;;  %v196_v12 = vld [vmem:[%s1374_s27 + $0x18] sm:$0xff] }
  0x32   : > { %1112 = vmatpush3.bf16.msra.mxu0 %v1232_v22  ;;  %v1272_v6 = vld [vmem:[#allocation2 + $0x100] sm:$0xff]   ;;  %v199_v9 = vld [vmem:[%s1374_s27 + $0x30] sm:$0xff]  ;;  %v200_v13 = vld [vmem:[%s1374_s27 + $0x38] sm:$0xff] }
  0x33   : > { %1134 = vmatpush3.bf16.msra.mxu1 %v1233_v23  ;;  %1113 = vmatprep.subr.bf16.mxu0 %v1234_v24  ;;  %v1273_v7 = vld [vmem:[#allocation2 + $0x180] sm:$0xff]   ;;  %v1021_v10 = vcombine.low %v195_v8, %v199_v9  ;;  %v1022_v11 = vcombine.high %v195_v8, %v199_v9  ;;  %v1023_v14 = vcombine.low %v196_v12, %v200_v13 }
  0x34   : > { %1135 = vmatprep.subr.bf16.mxu1 %v1235_v25  ;;  %v1024_v15 = vcombine.high %v196_v12, %v200_v13  ;;  %v1016_v23 = vld [vmem:[%s1396_s2] ss:$0 sm:$0xff] }
  0x36   : > { %1114 = vmatpush3.bf16.msra.mxu0 %v1236_v26 }
  0x37   : > { %1136 = vmatpush3.bf16.msra.mxu1 %v1237_v27  ;;  %1115 = vmatprep.subr.bf16.mxu0 %v1238_v28 }
  0x38   : > { %1137 = vmatprep.subr.bf16.mxu1 %v1239_v29 }
  0x3a   : > { %1116 = vmatpush3.bf16.msra.mxu0 %v1240_v30 }
  0x3b   : > { %1138 = vmatpush3.bf16.msra.mxu1 %v1241_v31  ;;  %1145 = vmatprep.subr.bf16.mxu0 %v1242_v40 }
  0x3c   : > { %1167 = vmatprep.subr.bf16.mxu1 %v1243_v41 }
  0x3d   : > { %793 = vmatmul.mubr.bf16.vlgmr.msra.gmra.mxu0 %v1017_v35 }
  0x3e   : > { %834 = vmatmul.mubr.bf16.vlgmr.msra.gmra.mxu1 %v1019_v38  ;;  %1146 = vmatpush3.bf16.msra.mxu0 %v1244_v42 }
  0x3f   : > { %1168 = vmatpush3.bf16.msra.mxu1 %v1245_v43  ;;  %1147 = vmatprep.subr.bf16.mxu0 %v1246_v44 }
  0x40   : > { %1169 = vmatprep.subr.bf16.mxu1 %v1247_v45  ;;  %874 = vmatprep.mubr.bf16.mxu0 %v1022_v11 }
  0x41   : > { %915 = vmatprep.mubr.bf16.mxu1 %v1024_v15 }
  0x42   : > { %1148 = vmatpush3.bf16.msra.mxu0 %v1248_v46 }
  0x43   : > { %1170 = vmatpush3.bf16.msra.mxu1 %v1249_v47  ;;  %1149 = vmatprep.subr.bf16.mxu0 %v1250_v48 }
  0x44   : > { %1171 = vmatprep.subr.bf16.mxu1 %v1251_v49 }
  0x46   : > { %1150 = vmatpush3.bf16.msra.mxu0 %v1252_v50 }
  0x47   : > { %1172 = vmatpush3.bf16.msra.mxu1 %v1253_v51  ;;  %1151 = vmatprep.subr.bf16.mxu0 %v1254_v52 }
  0x48   : > { %1173 = vmatprep.subr.bf16.mxu1 %v1255_v53 }
  0x4a   : > { %1152 = vmatpush3.bf16.msra.mxu0 %v1256_v54 }
  0x4b   : > { %1174 = vmatpush3.bf16.msra.mxu1 %v1257_v55  ;;  %1153 = vmatprep.subr.bf16.mxu0 %v1258_v56 }
  0x4c   : > { %1175 = vmatprep.subr.bf16.mxu1 %v1259_v57 }
  0x4e   : > { %1154 = vmatpush3.bf16.msra.mxu0 %v1260_v58 }
  0x4f   : > { %1176 = vmatpush3.bf16.msra.mxu1 %v1261_v59  ;;  %1155 = vmatprep.subr.bf16.mxu0 %v1262_v60 }
  0x50   : > { %1177 = vmatprep.subr.bf16.mxu1 %v1263_v61 }
  0x52   : > { %1156 = vmatpush3.bf16.msra.mxu0 %v1264_v62 }
  0x53   : > { %1178 = vmatpush3.bf16.msra.mxu1 %v1265_v63  ;;  %1157 = vmatprep.subr.bf16.mxu0 %v1266_v0 }
  0x54   : > { %1179 = vmatprep.subr.bf16.mxu1 %v1267_v1 }
  0x56   : > { %1158 = vmatpush3.bf16.msra.mxu0 %v1268_v2 }
  0x57   : > { %1180 = vmatpush3.bf16.msra.mxu1 %v1269_v3  ;;  %1159 = vmatprep.subr.bf16.mxu0 %v1270_v4 }
  0x58   : > { %1181 = vmatprep.subr.bf16.mxu1 %v1271_v5 }
  0x5a   : > { %1160 = vmatpush3.bf16.msra.mxu0 %v1272_v6 }
  0x5b   : > { %1182 = vmatpush3.bf16.msra.mxu1 %v1273_v7 }
  0x5d   : > { %875 = vmatmul.mubr.bf16.vlgmr.msra.gmra.mxu0 %v1021_v10 }
  0x5e   : > { %916 = vmatmul.mubr.bf16.vlgmr.msra.gmra.mxu1 %v1023_v14 }
  0xfd   : > { %v1117_v16 = vpop.f32.mrf.mxu0 }
  0xfe   : > { %v1139_v17 = vpop.f32.mrf.mxu1 }
  0xff   : > { %v1118_v18 = vpop.f32.mrf.mxu0 }
 0x100   : > { %v1140_v19 = vpop.f32.mrf.mxu1  ;;  %v1119_v21 = vadd.f32 %v1118_v18, %v1117_v16 }
 0x101   : > { %v1120_v20 = vpop.f32.mrf.mxu0  ;;  %v1141_v26 = vadd.f32 %v1140_v19, %v1139_v17 }
 0x102   : > { %v1142_v22 = vpop.f32.mrf.mxu1  ;;  %v795_v25 = vadd.f32 %v1119_v21, %v1016_v23 }
 0x103   : > { %v1121_v24 = vpop.f32.mrf.mxu0 }
 0x104   : > { %v1122_v27 = vadd.f32 %v1121_v24, %v1120_v20  ;;  %v1143_v28 = vpop.f32.mrf.mxu1  ;;  %v836_v32 = vadd.f32 %v1141_v26, %v795_v25 }
 0x105   : > { %v1144_v37 = vadd.f32 %v1143_v28, %v1142_v22 }
 0x106   : > { %v798_v33 = vadd.f32 %v1122_v27, %v1016_v23 }
 0x108   : > { %v839_v41 = vadd.f32 %v1144_v37, %v798_v33 }
 0x11d   : > { %v1161_v29 = vpop.f32.mrf.mxu0 }
 0x11e   : > { %v1183_v30 = vpop.f32.mrf.mxu1 }
 0x11f   : > { %v1162_v31 = vpop.f32.mrf.mxu0 }
 0x120   : > { %v1163_v34 = vadd.f32 %v1162_v31, %v1161_v29  ;;  %v1184_v35 = vpop.f32.mrf.mxu1 }
 0x121   : > { %v1164_v36 = vpop.f32.mrf.mxu0  ;;  %v1185_v42 = vadd.f32 %v1184_v35, %v1183_v30 }
 0x122   : > { %v877_v38 = vadd.f32 %v1163_v34, %v836_v32  ;;  %v1186_v39 = vpop.f32.mrf.mxu1 }
 0x123   : > { %v1165_v40 = vpop.f32.mrf.mxu0 }
 0x124   : > { %v1166_v43 = vadd.f32 %v1165_v40, %v1164_v36  ;;  %v1187_v44 = vpop.f32.mrf.mxu1  ;;  %v918_v45 = vadd.f32 %v1185_v42, %v877_v38 }
 0x125   : > { %v1188_v47 = vadd.f32 %v1187_v44, %v1186_v39 }
 0x126   : > { %v880_v46 = vadd.f32 %v1166_v43, %v839_v41  ;;  %v924_v49 = vmax.f32 %v918_v45, 0.0 }
 0x128   : > { %v921_v48 = vadd.f32 %v1188_v47, %v880_v46 }
 0x12a   : > { %v925_v50 = vmax.f32 %v921_v48, 0.0 }
 0x12c   : > { %v1099_v51 = vpack.c.bf16 %v925_v50, %v924_v49 }
 0x12e   : > { %1100 = vst [vmem:[%s190_s6] sm:$0xff] %v1099_v51  }
 0x12f PF: > { %s14_s12 = sadd.s32 1, %s1310_s12  }
 0x130   : > { %p11_p1 = scmp.ge.s32.totalorder %s14_s12, 4  }
 0x132   :  { %13 = sbr.rel (!%p11_p1) target bundleno = 1 (0x1), region = 67 }
 0x137   :  { %958 = vsyncpa [#allocation3], 1 }
 0x138   :  { %960 = vsyncpa [#allocation3 + $0x1], 1 }

// kernel: classifier_forward.5
= control target key start
LH: loop header
LB: loop body
LE: loop exit
PB: predicated region body
PF: predicated region fallthrough
CT: control target
= control target key end

     0   :  { %s3912_s0 = inlined_call_operand.vmem [shape: bf16[8,2048], index: 0, kind: input, shape index: {}]   ;;  %s3913_s1 = inlined_call_operand.vmem [shape: bf16[2048,256], index: 1, kind: input, shape index: {}]   ;;  %s3914_s2 = inlined_call_operand.vmem [shape: f32[1,256], index: 2, kind: input, shape index: {}]   ;;  %s3915_s3 = inlined_call_operand.vmem [shape: f32[2,8], index: 3, kind: input, shape index: {}]   ;;  %s3916_s4 = inlined_call_operand.vmem [shape: bf16[256,128], index: 4, kind: input, shape index: {}]   ;;  %s3917_s5 = inlined_call_operand.vmem [shape: f32[1,128], index: 5, kind: input, shape index: {}]   ;;  %s3918_s6 = inlined_call_operand.hbm [shape: f32[2,128], index: 6, kind: output, shape index: {}]  }
   0x1   :  { %v2549_v0 = vld [vmem:[%s3913_s1 + $0x74] ss:$8 sps:$4 sm:$0xff]   ;;  %v2553_v2 = vld [vmem:[%s3913_s1 + $0x70] ss:$8 sps:$4 sm:$0xff]   ;;  %v2555_v4 = vld [vmem:[%s3913_s1 + $0x64] ss:$8 sps:$4 sm:$0xff]  }
   0x2   :  { %v2551_v1 = vld [vmem:[%s3913_s1 + $0x174] ss:$8 sps:$4 sm:$0xff]   ;;  %1637 = vmatprep.subr.bf16.mxu0 %v2549_v0  ;;  %v2554_v3 = vld [vmem:[%s3913_s1 + $0x170] ss:$8 sps:$4 sm:$0xff]   ;;  %v2557_v5 = vld [vmem:[%s3913_s1 + $0x164] ss:$8 sps:$4 sm:$0xff]  }
   0x3   :  { %1678 = vmatprep.subr.bf16.mxu1 %v2551_v1  ;;  %1638 = vmatpush1.bf16.msra.mxu0 %v2553_v2  ;;  %v2559_v6 = vld [vmem:[%s3913_s1 + $0x60] ss:$8 sps:$4 sm:$0xff]   ;;  %v2561_v8 = vld [vmem:[%s3913_s1 + $0x54] ss:$8 sps:$4 sm:$0xff]   ;;  %v2565_v10 = vld [vmem:[%s3913_s1 + $0x50] ss:$8 sps:$4 sm:$0xff]  }
   0x4   :  { %1679 = vmatpush1.bf16.msra.mxu1 %v2554_v3  ;;  %1639 = vmatprep.subr.bf16.mxu0 %v2555_v4  ;;  %v2560_v7 = vld [vmem:[%s3913_s1 + $0x160] ss:$8 sps:$4 sm:$0xff]   ;;  %v2563_v9 = vld [vmem:[%s3913_s1 + $0x154] ss:$8 sps:$4 sm:$0xff]   ;;  %v2566_v11 = vld [vmem:[%s3913_s1 + $0x150] ss:$8 sps:$4 sm:$0xff]  }
   0x5   :  { %1680 = vmatprep.subr.bf16.mxu1 %v2557_v5  ;;  %v2567_v12 = vld [vmem:[%s3913_s1 + $0x44] ss:$8 sps:$4 sm:$0xff]   ;;  %v2571_v14 = vld [vmem:[%s3913_s1 + $0x40] ss:$8 sps:$4 sm:$0xff]   ;;  %v2573_v16 = vld [vmem:[%s3913_s1 + $0x34] ss:$8 sps:$4 sm:$0xff]  }
   0x6   :  { %v2569_v13 = vld [vmem:[%s3913_s1 + $0x144] ss:$8 sps:$4 sm:$0xff]   ;;  %v2572_v15 = vld [vmem:[%s3913_s1 + $0x140] ss:$8 sps:$4 sm:$0xff]   ;;  %v2575_v17 = vld [vmem:[%s3913_s1 + $0x134] ss:$8 sps:$4 sm:$0xff]  }
   0x7   :  { %1640 = vmatpush1.bf16.msra.mxu0 %v2559_v6  ;;  %v2577_v18 = vld [vmem:[%s3913_s1 + $0x30] ss:$8 sps:$4 sm:$0xff]   ;;  %v2579_v20 = vld [vmem:[%s3913_s1 + $0x24] ss:$8 sps:$4 sm:$0xff]   ;;  %v2583_v22 = vld [vmem:[%s3913_s1 + $0x20] ss:$8 sps:$4 sm:$0xff]  }
   0x8   :  { %1681 = vmatpush1.bf16.msra.mxu1 %v2560_v7  ;;  %1641 = vmatprep.subr.bf16.mxu0 %v2561_v8  ;;  %v2578_v19 = vld [vmem:[%s3913_s1 + $0x130] ss:$8 sps:$4 sm:$0xff]   ;;  %v2581_v21 = vld [vmem:[%s3913_s1 + $0x124] ss:$8 sps:$4 sm:$0xff]   ;;  %v2584_v23 = vld [vmem:[%s3913_s1 + $0x120] ss:$8 sps:$4 sm:$0xff]  }
   0x9   :  { %1682 = vmatprep.subr.bf16.mxu1 %v2563_v9  ;;  %v2585_v24 = vld [vmem:[%s3913_s1 + $0x14] ss:$8 sps:$4 sm:$0xff]   ;;  %v2589_v26 = vld [vmem:[%s3913_s1 + $0x10] ss:$8 sps:$4 sm:$0xff]   ;;  %v2591_v28 = vld [vmem:[%s3913_s1 + $0x4] ss:$8 sps:$4 sm:$0xff]  }
   0xa   :  { %v2587_v25 = vld [vmem:[%s3913_s1 + $0x114] ss:$8 sps:$4 sm:$0xff]   ;;  %v2590_v27 = vld [vmem:[%s3913_s1 + $0x110] ss:$8 sps:$4 sm:$0xff]   ;;  %v2593_v29 = vld [vmem:[%s3913_s1 + $0x104] ss:$8 sps:$4 sm:$0xff]  }
   0xb   :  { %1642 = vmatpush1.bf16.msra.mxu0 %v2565_v10  ;;  %v2595_v30 = vld [vmem:[%s3913_s1] ss:$8 sps:$4 sm:$0xff]   ;;  %v2597_v32 = vld [vmem:[%s3913_s1 + $0xf4] ss:$8 sps:$4 sm:$0xff]   ;;  %v2601_v34 = vld [vmem:[%s3913_s1 + $0xf0] ss:$8 sps:$4 sm:$0xff]  }
   0xc   :  { %1683 = vmatpush1.bf16.msra.mxu1 %v2566_v11  ;;  %1643 = vmatprep.subr.bf16.mxu0 %v2567_v12  ;;  %v2596_v31 = vld [vmem:[%s3913_s1 + $0x100] ss:$8 sps:$4 sm:$0xff]   ;;  %v2599_v33 = vld [vmem:[%s3913_s1 + $0x1f4] ss:$8 sps:$4 sm:$0xff]   ;;  %v2602_v35 = vld [vmem:[%s3913_s1 + $0x1f0] ss:$8 sps:$4 sm:$0xff]  }
   0xd   :  { %1684 = vmatprep.subr.bf16.mxu1 %v2569_v13  ;;  %v2603_v36 = vld [vmem:[%s3913_s1 + $0xe4] ss:$8 sps:$4 sm:$0xff]   ;;  %v2607_v38 = vld [vmem:[%s3913_s1 + $0xe0] ss:$8 sps:$4 sm:$0xff]   ;;  %v2609_v40 = vld [vmem:[%s3913_s1 + $0xd4] ss:$8 sps:$4 sm:$0xff]  }
   0xe   :  { %v2605_v37 = vld [vmem:[%s3913_s1 + $0x1e4] ss:$8 sps:$4 sm:$0xff]   ;;  %v2608_v39 = vld [vmem:[%s3913_s1 + $0x1e0] ss:$8 sps:$4 sm:$0xff]   ;;  %v2611_v41 = vld [vmem:[%s3913_s1 + $0x1d4] ss:$8 sps:$4 sm:$0xff]  }
   0xf   :  { %1644 = vmatpush1.bf16.msra.mxu0 %v2571_v14  ;;  %v2613_v42 = vld [vmem:[%s3913_s1 + $0xd0] ss:$8 sps:$4 sm:$0xff]   ;;  %v2615_v44 = vld [vmem:[%s3913_s1 + $0xc4] ss:$8 sps:$4 sm:$0xff]   ;;  %v2619_v49 = vld [vmem:[%s3913_s1 + $0xc0] ss:$8 sps:$4 sm:$0xff]  }
  0x10   :  { %1685 = vmatpush1.bf16.msra.mxu1 %v2572_v15  ;;  %1645 = vmatprep.subr.bf16.mxu0 %v2573_v16  ;;  %v2614_v43 = vld [vmem:[%s3913_s1 + $0x1d0] ss:$8 sps:$4 sm:$0xff]   ;;  %v2617_v45 = vld [vmem:[%s3913_s1 + $0x1c4] ss:$8 sps:$4 sm:$0xff]   ;;  %v2620_v50 = vld [vmem:[%s3913_s1 + $0x1c0] ss:$8 sps:$4 sm:$0xff]  }
  0x11   :  { %1686 = vmatprep.subr.bf16.mxu1 %v2575_v17  ;;  %v25_v46 = vld [vmem:[%s3912_s0] sm:$0xff]  ;;  %v26_v48 = vld [vmem:[%s3912_s0 + $0x8] sm:$0xff]  ;;  %v2621_v52 = vld [vmem:[%s3913_s1 + $0xb4] ss:$8 sps:$4 sm:$0xff]  }
  0x12   :  { %v2236_v47 = vcombine.high %v25_v46, %v25_v46  ;;  %v2238_v51 = vcombine.high %v26_v48, %v26_v48  ;;  %v2623_v53 = vld [vmem:[%s3913_s1 + $0x1b4] ss:$8 sps:$4 sm:$0xff]   ;;  %v2625_v54 = vld [vmem:[%s3913_s1 + $0xb0] ss:$8 sps:$4 sm:$0xff]   ;;  %v2627_v56 = vld [vmem:[%s3913_s1 + $0xa4] ss:$8 sps:$4 sm:$0xff]   ;;  %v2235_v6 = vcombine.low %v25_v46, %v25_v46  ;;  %v2237_v7 = vcombine.low %v26_v48, %v26_v48 }
  0x13   :  { %1646 = vmatpush1.bf16.msra.mxu0 %v2577_v18  ;;  %v2626_v55 = vld [vmem:[%s3913_s1 + $0x1b0] ss:$8 sps:$4 sm:$0xff]   ;;  %v2629_v57 = vld [vmem:[%s3913_s1 + $0x1a4] ss:$8 sps:$4 sm:$0xff]   ;;  %v2631_v58 = vld [vmem:[%s3913_s1 + $0xa0] ss:$8 sps:$4 sm:$0xff]  }
  0x14   :  { %1687 = vmatpush1.bf16.msra.mxu1 %v2578_v19  ;;  %1647 = vmatprep.subr.bf16.mxu0 %v2579_v20  ;;  %v2632_v59 = vld [vmem:[%s3913_s1 + $0x1a0] ss:$8 sps:$4 sm:$0xff]   ;;  %v2633_v60 = vld [vmem:[%s3913_s1 + $0x94] ss:$8 sps:$4 sm:$0xff]   ;;  %v2637_v62 = vld [vmem:[%s3913_s1 + $0x90] ss:$8 sps:$4 sm:$0xff]  }
  0x15   :  { %1688 = vmatprep.subr.bf16.mxu1 %v2581_v21  ;;  %1669 = vmatprep.mubr.bf16.mxu0 %v2236_v47  ;;  %v2635_v61 = vld [vmem:[%s3913_s1 + $0x194] ss:$8 sps:$4 sm:$0xff]   ;;  %v2638_v63 = vld [vmem:[%s3913_s1 + $0x190] ss:$8 sps:$4 sm:$0xff]   ;;  %v2639_v0 = vld [vmem:[%s3913_s1 + $0x84] ss:$8 sps:$4 sm:$0xff]  }
  0x16   :  { %1710 = vmatprep.mubr.bf16.mxu1 %v2238_v51  ;;  %v2641_v1 = vld [vmem:[%s3913_s1 + $0x184] ss:$8 sps:$4 sm:$0xff]   ;;  %v2643_v2 = vld [vmem:[%s3913_s1 + $0x80] ss:$8 sps:$4 sm:$0xff]   ;;  %v2651_v4 = vld [vmem:[%s3913_s1 + $0x274] ss:$8 sps:$4 sm:$0xff]  }
  0x17   :  { %1648 = vmatpush1.bf16.msra.mxu0 %v2583_v22  ;;  %v2644_v3 = vld [vmem:[%s3913_s1 + $0x180] ss:$8 sps:$4 sm:$0xff]   ;;  %v2654_v5 = vld [vmem:[%s3913_s1 + $0x374] ss:$8 sps:$4 sm:$0xff]   ;;  %v2649_v8 = vld [vmem:[%s3913_s1 + $0x270] ss:$8 sps:$4 sm:$0xff]  }
  0x18   :  { %1689 = vmatpush1.bf16.msra.mxu1 %v2584_v23  ;;  %1649 = vmatprep.subr.bf16.mxu0 %v2585_v24  ;;  %v2652_v9 = vld [vmem:[%s3913_s1 + $0x370] ss:$8 sps:$4 sm:$0xff]   ;;  %v2657_v10 = vld [vmem:[%s3913_s1 + $0x264] ss:$8 sps:$4 sm:$0xff]   ;;  %v2655_v12 = vld [vmem:[%s3913_s1 + $0x260] ss:$8 sps:$4 sm:$0xff]  }
  0x19   :  { %1690 = vmatprep.subr.bf16.mxu1 %v2587_v25  ;;  %v2660_v11 = vld [vmem:[%s3913_s1 + $0x364] ss:$8 sps:$4 sm:$0xff]   ;;  %v2658_v13 = vld [vmem:[%s3913_s1 + $0x360] ss:$8 sps:$4 sm:$0xff]   ;;  %v2663_v14 = vld [vmem:[%s3913_s1 + $0x254] ss:$8 sps:$4 sm:$0xff]  }
  0x1a   :  { %v2666_v15 = vld [vmem:[%s3913_s1 + $0x354] ss:$8 sps:$4 sm:$0xff]   ;;  %v2661_v16 = vld [vmem:[%s3913_s1 + $0x250] ss:$8 sps:$4 sm:$0xff]   ;;  %v2669_v18 = vld [vmem:[%s3913_s1 + $0x244] ss:$8 sps:$4 sm:$0xff]  }
  0x1b   :  { %1650 = vmatpush1.bf16.msra.mxu0 %v2589_v26  ;;  %v2664_v17 = vld [vmem:[%s3913_s1 + $0x350] ss:$8 sps:$4 sm:$0xff]   ;;  %v2672_v19 = vld [vmem:[%s3913_s1 + $0x344] ss:$8 sps:$4 sm:$0xff]   ;;  %v2667_v20 = vld [vmem:[%s3913_s1 + $0x240] ss:$8 sps:$4 sm:$0xff]  }
  0x1c   :  { %1691 = vmatpush1.bf16.msra.mxu1 %v2590_v27  ;;  %1651 = vmatprep.subr.bf16.mxu0 %v2591_v28  ;;  %v2670_v21 = vld [vmem:[%s3913_s1 + $0x340] ss:$8 sps:$4 sm:$0xff]   ;;  %v2675_v22 = vld [vmem:[%s3913_s1 + $0x234] ss:$8 sps:$4 sm:$0xff]   ;;  %v2673_v24 = vld [vmem:[%s3913_s1 + $0x230] ss:$8 sps:$4 sm:$0xff]  }
  0x1d   :  { %1692 = vmatprep.subr.bf16.mxu1 %v2593_v29  ;;  %v2678_v23 = vld [vmem:[%s3913_s1 + $0x334] ss:$8 sps:$4 sm:$0xff]   ;;  %v2676_v25 = vld [vmem:[%s3913_s1 + $0x330] ss:$8 sps:$4 sm:$0xff]   ;;  %v2681_v26 = vld [vmem:[%s3913_s1 + $0x224] ss:$8 sps:$4 sm:$0xff]  }
  0x1e   :  { %v2684_v27 = vld [vmem:[%s3913_s1 + $0x324] ss:$8 sps:$4 sm:$0xff]   ;;  %v2679_v28 = vld [vmem:[%s3913_s1 + $0x220] ss:$8 sps:$4 sm:$0xff]   ;;  %v2714_v51 = vld [vmem:[%s3913_s1 + $0x3d4] ss:$8 sps:$4 sm:$0xff]  }
  0x1f   :  { %1652 = vmatpush1.bf16.msra.mxu0 %v2595_v30  ;;  %v2682_v29 = vld [vmem:[%s3913_s1 + $0x320] ss:$8 sps:$4 sm:$0xff]   ;;  %v2687_v30 = vld [vmem:[%s3913_s1 + $0x214] ss:$8 sps:$4 sm:$0xff]   ;;  %v2705_v46 = vld [vmem:[%s3913_s1 + $0x2e4] ss:$8 sps:$4 sm:$0xff]  }
  0x20   :  { %1693 = vmatpush1.bf16.msra.mxu1 %v2596_v31  ;;  %1653 = vmatprep.subr.bf16.mxu0 %v2597_v32  ;;  %v2690_v31 = vld [vmem:[%s3913_s1 + $0x314] ss:$8 sps:$4 sm:$0xff]   ;;  %v2708_v47 = vld [vmem:[%s3913_s1 + $0x3e4] ss:$8 sps:$4 sm:$0xff]   ;;  %v2703_v48 = vld [vmem:[%s3913_s1 + $0x2e0] ss:$8 sps:$4 sm:$0xff]  }
  0x21   :  { %1694 = vmatprep.subr.bf16.mxu1 %v2599_v33  ;;  %v3303_v32 = vld [vmem:[%s3912_s0 + $0x10] sm:$0xff]  ;;  %v3308_v33 = vld [vmem:[%s3912_s0 + $0x18] sm:$0xff] }
  0x23   :  { %1654 = vmatpush2.bf16.msra.mxu0 %v2601_v34  ;;  %v2685_v34 = vld [vmem:[%s3913_s1 + $0x210] ss:$8 sps:$4 sm:$0xff]  }
  0x24   :  { %1695 = vmatpush2.bf16.msra.mxu1 %v2602_v35  ;;  %1655 = vmatprep.subr.bf16.mxu0 %v2603_v36  ;;  %v2688_v35 = vld [vmem:[%s3913_s1 + $0x310] ss:$8 sps:$4 sm:$0xff]   ;;  %v2240_v36 = vcombine.high %v3303_v32, %v3303_v32 }
  0x25   :  { %1696 = vmatprep.subr.bf16.mxu1 %v2605_v37  ;;  %v2242_v37 = vcombine.high %v3308_v33, %v3308_v33 }
  0x27   :  { %1656 = vmatpush2.bf16.msra.mxu0 %v2607_v38  ;;  %v2693_v38 = vld [vmem:[%s3913_s1 + $0x204] ss:$8 sps:$4 sm:$0xff]  }
  0x28   :  { %1697 = vmatpush2.bf16.msra.mxu1 %v2608_v39  ;;  %1657 = vmatprep.subr.bf16.mxu0 %v2609_v40  ;;  %v2696_v39 = vld [vmem:[%s3913_s1 + $0x304] ss:$8 sps:$4 sm:$0xff]   ;;  %v2691_v40 = vld [vmem:[%s3913_s1 + $0x200] ss:$8 sps:$4 sm:$0xff]  }
  0x29   :  { %1698 = vmatprep.subr.bf16.mxu1 %v2611_v41  ;;  %v2694_v41 = vld [vmem:[%s3913_s1 + $0x300] ss:$8 sps:$4 sm:$0xff]  }
  0x2b   :  { %1658 = vmatpush2.bf16.msra.mxu0 %v2613_v42  ;;  %v2699_v42 = vld [vmem:[%s3913_s1 + $0x2f4] ss:$8 sps:$4 sm:$0xff]  }
  0x2c   :  { %1699 = vmatpush2.bf16.msra.mxu1 %v2614_v43  ;;  %1659 = vmatprep.subr.bf16.mxu0 %v2615_v44  ;;  %v2702_v43 = vld [vmem:[%s3913_s1 + $0x3f4] ss:$8 sps:$4 sm:$0xff]   ;;  %v2697_v44 = vld [vmem:[%s3913_s1 + $0x2f0] ss:$8 sps:$4 sm:$0xff]  }
  0x2d   :  { %1700 = vmatprep.subr.bf16.mxu1 %v2617_v45  ;;  %v2700_v45 = vld [vmem:[%s3913_s1 + $0x3f0] ss:$8 sps:$4 sm:$0xff]  }
  0x2f   :  { %1660 = vmatpush2.bf16.msra.mxu0 %v2619_v49  ;;  %v2706_v49 = vld [vmem:[%s3913_s1 + $0x3e0] ss:$8 sps:$4 sm:$0xff]  }
  0x30   :  { %1701 = vmatpush2.bf16.msra.mxu1 %v2620_v50  ;;  %1661 = vmatprep.subr.bf16.mxu0 %v2621_v52  ;;  %v2711_v50 = vld [vmem:[%s3913_s1 + $0x2d4] ss:$8 sps:$4 sm:$0xff]   ;;  %v2709_v52 = vld [vmem:[%s3913_s1 + $0x2d0] ss:$8 sps:$4 sm:$0xff]  }
  0x31   :  { %1702 = vmatprep.subr.bf16.mxu1 %v2623_v53  ;;  %v2712_v53 = vld [vmem:[%s3913_s1 + $0x3d0] ss:$8 sps:$4 sm:$0xff]  }
  0x33   :  { %1662 = vmatpush2.bf16.msra.mxu0 %v2625_v54  ;;  %v2717_v54 = vld [vmem:[%s3913_s1 + $0x2c4] ss:$8 sps:$4 sm:$0xff]  }
  0x34   :  { %1703 = vmatpush2.bf16.msra.mxu1 %v2626_v55  ;;  %1663 = vmatprep.subr.bf16.mxu0 %v2627_v56  ;;  %v2720_v55 = vld [vmem:[%s3913_s1 + $0x3c4] ss:$8 sps:$4 sm:$0xff]   ;;  %v2715_v56 = vld [vmem:[%s3913_s1 + $0x2c0] ss:$8 sps:$4 sm:$0xff]  }
  0x35   :  { %1704 = vmatprep.subr.bf16.mxu1 %v2629_v57  ;;  %v2718_v57 = vld [vmem:[%s3913_s1 + $0x3c0] ss:$8 sps:$4 sm:$0xff]  }
  0x37   :  { %1664 = vmatpush2.bf16.msra.mxu0 %v2631_v58  ;;  %v2723_v58 = vld [vmem:[%s3913_s1 + $0x2b4] ss:$8 sps:$4 sm:$0xff]  }
  0x38   :  { %1705 = vmatpush2.bf16.msra.mxu1 %v2632_v59  ;;  %1665 = vmatprep.subr.bf16.mxu0 %v2633_v60  ;;  %v2726_v59 = vld [vmem:[%s3913_s1 + $0x3b4] ss:$8 sps:$4 sm:$0xff]   ;;  %v2721_v60 = vld [vmem:[%s3913_s1 + $0x2b0] ss:$8 sps:$4 sm:$0xff]  }
  0x39   :  { %1706 = vmatprep.subr.bf16.mxu1 %v2635_v61  ;;  %v2724_v61 = vld [vmem:[%s3913_s1 + $0x3b0] ss:$8 sps:$4 sm:$0xff]  }
  0x3b   :  { %1666 = vmatpush2.bf16.msra.mxu0 %v2637_v62  ;;  %v2729_v62 = vld [vmem:[%s3913_s1 + $0x2a4] ss:$8 sps:$4 sm:$0xff]  }
  0x3c   :  { %1707 = vmatpush2.bf16.msra.mxu1 %v2638_v63  ;;  %1667 = vmatprep.subr.bf16.mxu0 %v2639_v0  ;;  %v2732_v63 = vld [vmem:[%s3913_s1 + $0x3a4] ss:$8 sps:$4 sm:$0xff]   ;;  %v2727_v0 = vld [vmem:[%s3913_s1 + $0x2a0] ss:$8 sps:$4 sm:$0xff]  }
  0x3d   :  { %1708 = vmatprep.subr.bf16.mxu1 %v2641_v1  ;;  %v2730_v1 = vld [vmem:[%s3913_s1 + $0x3a0] ss:$8 sps:$4 sm:$0xff]  }
  0x3f   :  { %1668 = vmatpush2.bf16.msra.mxu0 %v2643_v2  ;;  %v2735_v2 = vld [vmem:[%s3913_s1 + $0x294] ss:$8 sps:$4 sm:$0xff]  }
  0x40   :  { %1709 = vmatpush2.bf16.msra.mxu1 %v2644_v3  ;;  %1719 = vmatprep.subr.bf16.mxu0 %v2651_v4  ;;  %v2738_v3 = vld [vmem:[%s3913_s1 + $0x394] ss:$8 sps:$4 sm:$0xff]   ;;  %v2733_v4 = vld [vmem:[%s3913_s1 + $0x290] ss:$8 sps:$4 sm:$0xff]  }
  0x41   :  { %1760 = vmatprep.subr.bf16.mxu1 %v2654_v5  ;;  %v2736_v5 = vld [vmem:[%s3913_s1 + $0x390] ss:$8 sps:$4 sm:$0xff]  }
  0x42   :  { %1670 = vmatmul.mubr.bf16.vlgmr.msra.gmra.mxu0 %v2235_v6  ;;  %v2741_v6 = vld [vmem:[%s3913_s1 + $0x284] ss:$8 sps:$4 sm:$0xff]  }
  0x43   :  { %1711 = vmatmul.mubr.bf16.vlgmr.msra.gmra.mxu1 %v2237_v7  ;;  %1720 = vmatpush1.bf16.msra.mxu0 %v2649_v8  ;;  %v2744_v7 = vld [vmem:[%s3913_s1 + $0x384] ss:$8 sps:$4 sm:$0xff]   ;;  %v2739_v8 = vld [vmem:[%s3913_s1 + $0x280] ss:$8 sps:$4 sm:$0xff]  }
  0x44   :  { %1761 = vmatpush1.bf16.msra.mxu1 %v2652_v9  ;;  %1721 = vmatprep.subr.bf16.mxu0 %v2657_v10  ;;  %v2742_v9 = vld [vmem:[%s3913_s1 + $0x380] ss:$8 sps:$4 sm:$0xff]   ;;  %v2751_v10 = vld [vmem:[%s3913_s1 + $0x474] ss:$8 sps:$4 sm:$0xff]  }
  0x45   :  { %1762 = vmatprep.subr.bf16.mxu1 %v2660_v11  ;;  %1751 = vmatprep.mubr.bf16.mxu0 %v2240_v36  ;;  %v2754_v11 = vld [vmem:[%s3913_s1 + $0x574] ss:$8 sps:$4 sm:$0xff]   ;;  %v2781_v36 = vld [vmem:[%s3913_s1 + $0x424] ss:$8 sps:$4 sm:$0xff]  }
  0x46   :  { %1792 = vmatprep.mubr.bf16.mxu1 %v2242_v37  ;;  %v2784_v37 = vld [vmem:[%s3913_s1 + $0x524] ss:$8 sps:$4 sm:$0xff]  }
  0x47   :  { %1722 = vmatpush1.bf16.msra.mxu0 %v2655_v12  ;;  %v2239_v12 = vcombine.low %v3303_v32, %v3303_v32  ;;  %v2775_v32 = vld [vmem:[%s3913_s1 + $0x434] ss:$8 sps:$4 sm:$0xff]  }
  0x48   :  { %1763 = vmatpush1.bf16.msra.mxu1 %v2658_v13  ;;  %1723 = vmatprep.subr.bf16.mxu0 %v2663_v14  ;;  %v2241_v13 = vcombine.low %v3308_v33, %v3308_v33  ;;  %v2749_v14 = vld [vmem:[%s3913_s1 + $0x470] ss:$8 sps:$4 sm:$0xff]   ;;  %v2778_v33 = vld [vmem:[%s3913_s1 + $0x534] ss:$8 sps:$4 sm:$0xff]  }
  0x49   :  { %1764 = vmatprep.subr.bf16.mxu1 %v2666_v15  ;;  %v2752_v15 = vld [vmem:[%s3913_s1 + $0x570] ss:$8 sps:$4 sm:$0xff]  }
  0x4b   :  { %1724 = vmatpush1.bf16.msra.mxu0 %v2661_v16  ;;  %v2757_v16 = vld [vmem:[%s3913_s1 + $0x464] ss:$8 sps:$4 sm:$0xff]  }
  0x4c   :  { %1765 = vmatpush1.bf16.msra.mxu1 %v2664_v17  ;;  %1725 = vmatprep.subr.bf16.mxu0 %v2669_v18  ;;  %v2760_v17 = vld [vmem:[%s3913_s1 + $0x564] ss:$8 sps:$4 sm:$0xff]  }
  0x4d   :  { %1766 = vmatprep.subr.bf16.mxu1 %v2672_v19  ;;  %v3453_v18 = vld [vmem:[%s3912_s0 + $0x20] sm:$0xff]  ;;  %v3458_v19 = vld [vmem:[%s3912_s0 + $0x28] sm:$0xff] }
  0x4f   :  { %1726 = vmatpush1.bf16.msra.mxu0 %v2667_v20  ;;  %v2244_v20 = vcombine.high %v3453_v18, %v3453_v18 }
  0x50   :  { %1767 = vmatpush1.bf16.msra.mxu1 %v2670_v21  ;;  %1727 = vmatprep.subr.bf16.mxu0 %v2675_v22  ;;  %v2246_v21 = vcombine.high %v3458_v19, %v3458_v19  ;;  %v2755_v22 = vld [vmem:[%s3913_s1 + $0x460] ss:$8 sps:$4 sm:$0xff]  }
  0x51   :  { %1768 = vmatprep.subr.bf16.mxu1 %v2678_v23  ;;  %v2758_v23 = vld [vmem:[%s3913_s1 + $0x560] ss:$8 sps:$4 sm:$0xff]  }
  0x53   :  { %1728 = vmatpush1.bf16.msra.mxu0 %v2673_v24  ;;  %v2763_v24 = vld [vmem:[%s3913_s1 + $0x454] ss:$8 sps:$4 sm:$0xff]  }
  0x54   :  { %1769 = vmatpush1.bf16.msra.mxu1 %v2676_v25  ;;  %1729 = vmatprep.subr.bf16.mxu0 %v2681_v26  ;;  %v2766_v25 = vld [vmem:[%s3913_s1 + $0x554] ss:$8 sps:$4 sm:$0xff]   ;;  %v2761_v26 = vld [vmem:[%s3913_s1 + $0x450] ss:$8 sps:$4 sm:$0xff]  }
  0x55   :  { %1770 = vmatprep.subr.bf16.mxu1 %v2684_v27  ;;  %v2764_v27 = vld [vmem:[%s3913_s1 + $0x550] ss:$8 sps:$4 sm:$0xff]  }
  0x57   :  { %1730 = vmatpush1.bf16.msra.mxu0 %v2679_v28  ;;  %v2769_v28 = vld [vmem:[%s3913_s1 + $0x444] ss:$8 sps:$4 sm:$0xff]  }
  0x58   :  { %1771 = vmatpush1.bf16.msra.mxu1 %v2682_v29  ;;  %1731 = vmatprep.subr.bf16.mxu0 %v2687_v30  ;;  %v2772_v29 = vld [vmem:[%s3913_s1 + $0x544] ss:$8 sps:$4 sm:$0xff]   ;;  %v2767_v30 = vld [vmem:[%s3913_s1 + $0x440] ss:$8 sps:$4 sm:$0xff]  }
  0x59   :  { %1772 = vmatprep.subr.bf16.mxu1 %v2690_v31  ;;  %v2770_v31 = vld [vmem:[%s3913_s1 + $0x540] ss:$8 sps:$4 sm:$0xff]  }
  0x5b   :  { %1732 = vmatpush1.bf16.msra.mxu0 %v2685_v34  ;;  %v2773_v34 = vld [vmem:[%s3913_s1 + $0x430] ss:$8 sps:$4 sm:$0xff]  }
  0x5c   :  { %1773 = vmatpush1.bf16.msra.mxu1 %v2688_v35  ;;  %1733 = vmatprep.subr.bf16.mxu0 %v2693_v38  ;;  %v2776_v35 = vld [vmem:[%s3913_s1 + $0x530] ss:$8 sps:$4 sm:$0xff]   ;;  %v2779_v38 = vld [vmem:[%s3913_s1 + $0x420] ss:$8 sps:$4 sm:$0xff]  }
  0x5d   :  { %1774 = vmatprep.subr.bf16.mxu1 %v2696_v39  ;;  %v2782_v39 = vld [vmem:[%s3913_s1 + $0x520] ss:$8 sps:$4 sm:$0xff]  }
  0x5f   :  { %1734 = vmatpush1.bf16.msra.mxu0 %v2691_v40  ;;  %v2787_v40 = vld [vmem:[%s3913_s1 + $0x414] ss:$8 sps:$4 sm:$0xff]  }
  0x60   :  { %1775 = vmatpush1.bf16.msra.mxu1 %v2694_v41  ;;  %1735 = vmatprep.subr.bf16.mxu0 %v2699_v42  ;;  %v2790_v41 = vld [vmem:[%s3913_s1 + $0x514] ss:$8 sps:$4 sm:$0xff]   ;;  %v2785_v42 = vld [vmem:[%s3913_s1 + $0x410] ss:$8 sps:$4 sm:$0xff]  }
  0x61   :  { %1776 = vmatprep.subr.bf16.mxu1 %v2702_v43  ;;  %v2788_v43 = vld [vmem:[%s3913_s1 + $0x510] ss:$8 sps:$4 sm:$0xff]  }
  0x63   :  { %1736 = vmatpush2.bf16.msra.mxu0 %v2697_v44  ;;  %v2793_v44 = vld [vmem:[%s3913_s1 + $0x404] ss:$8 sps:$4 sm:$0xff]  }
  0x64   :  { %1777 = vmatpush2.bf16.msra.mxu1 %v2700_v45  ;;  %1737 = vmatprep.subr.bf16.mxu0 %v2705_v46  ;;  %v2796_v45 = vld [vmem:[%s3913_s1 + $0x504] ss:$8 sps:$4 sm:$0xff]   ;;  %v2791_v46 = vld [vmem:[%s3913_s1 + $0x400] ss:$8 sps:$4 sm:$0xff]  }
  0x65   :  { %1778 = vmatprep.subr.bf16.mxu1 %v2708_v47  ;;  %v2794_v47 = vld [vmem:[%s3913_s1 + $0x500] ss:$8 sps:$4 sm:$0xff]  }
  0x67   :  { %1738 = vmatpush2.bf16.msra.mxu0 %v2703_v48  ;;  %v2799_v48 = vld [vmem:[%s3913_s1 + $0x4f4] ss:$8 sps:$4 sm:$0xff]  }
  0x68   :  { %1779 = vmatpush2.bf16.msra.mxu1 %v2706_v49  ;;  %1739 = vmatprep.subr.bf16.mxu0 %v2711_v50  ;;  %v2802_v49 = vld [vmem:[%s3913_s1 + $0x5f4] ss:$8 sps:$4 sm:$0xff]   ;;  %v2797_v50 = vld [vmem:[%s3913_s1 + $0x4f0] ss:$8 sps:$4 sm:$0xff]  }
  0x69   :  { %1780 = vmatprep.subr.bf16.mxu1 %v2714_v51  ;;  %v2800_v51 = vld [vmem:[%s3913_s1 + $0x5f0] ss:$8 sps:$4 sm:$0xff]  }
  0x6b   :  { %1740 = vmatpush2.bf16.msra.mxu0 %v2709_v52  ;;  %v2805_v52 = vld [vmem:[%s3913_s1 + $0x4e4] ss:$8 sps:$4 sm:$0xff]  }
  0x6c   :  { %1781 = vmatpush2.bf16.msra.mxu1 %v2712_v53  ;;  %1741 = vmatprep.subr.bf16.mxu0 %v2717_v54  ;;  %v2808_v53 = vld [vmem:[%s3913_s1 + $0x5e4] ss:$8 sps:$4 sm:$0xff]   ;;  %v2803_v54 = vld [vmem:[%s3913_s1 + $0x4e0] ss:$8 sps:$4 sm:$0xff]  }
  0x6d   :  { %1782 = vmatprep.subr.bf16.mxu1 %v2720_v55  ;;  %v2806_v55 = vld [vmem:[%s3913_s1 + $0x5e0] ss:$8 sps:$4 sm:$0xff]  }
  0x6f   :  { %1742 = vmatpush2.bf16.msra.mxu0 %v2715_v56  ;;  %v2811_v56 = vld [vmem:[%s3913_s1 + $0x4d4] ss:$8 sps:$4 sm:$0xff]  }
  0x70   :  { %1783 = vmatpush2.bf16.msra.mxu1 %v2718_v57  ;;  %1743 = vmatprep.subr.bf16.mxu0 %v2723_v58  ;;  %v2814_v57 = vld [vmem:[%s3913_s1 + $0x5d4] ss:$8 sps:$4 sm:$0xff]   ;;  %v2809_v58 = vld [vmem:[%s3913_s1 + $0x4d0] ss:$8 sps:$4 sm:$0xff]  }
  0x71   :  { %1784 = vmatprep.subr.bf16.mxu1 %v2726_v59  ;;  %v2812_v59 = vld [vmem:[%s3913_s1 + $0x5d0] ss:$8 sps:$4 sm:$0xff]  }
  0x73   :  { %1744 = vmatpush2.bf16.msra.mxu0 %v2721_v60  ;;  %v2817_v60 = vld [vmem:[%s3913_s1 + $0x4c4] ss:$8 sps:$4 sm:$0xff]  }
  0x74   :  { %1785 = vmatpush2.bf16.msra.mxu1 %v2724_v61  ;;  %1745 = vmatprep.subr.bf16.mxu0 %v2729_v62  ;;  %v2820_v61 = vld [vmem:[%s3913_s1 + $0x5c4] ss:$8 sps:$4 sm:$0xff]   ;;  %v2815_v62 = vld [vmem:[%s3913_s1 + $0x4c0] ss:$8 sps:$4 sm:$0xff]  }
  0x75   :  { %1786 = vmatprep.subr.bf16.mxu1 %v2732_v63  ;;  %v2818_v63 = vld [vmem:[%s3913_s1 + $0x5c0] ss:$8 sps:$4 sm:$0xff]  }
  0x77   :  { %1746 = vmatpush2.bf16.msra.mxu0 %v2727_v0  ;;  %v2823_v0 = vld [vmem:[%s3913_s1 + $0x4b4] ss:$8 sps:$4 sm:$0xff]  }
  0x78   :  { %1787 = vmatpush2.bf16.msra.mxu1 %v2730_v1  ;;  %1747 = vmatprep.subr.bf16.mxu0 %v2735_v2  ;;  %v2826_v1 = vld [vmem:[%s3913_s1 + $0x5b4] ss:$8 sps:$4 sm:$0xff]   ;;  %v2821_v2 = vld [vmem:[%s3913_s1 + $0x4b0] ss:$8 sps:$4 sm:$0xff]  }
  0x79   :  { %1788 = vmatprep.subr.bf16.mxu1 %v2738_v3  ;;  %v2824_v3 = vld [vmem:[%s3913_s1 + $0x5b0] ss:$8 sps:$4 sm:$0xff]  }
  0x7b   :  { %1748 = vmatpush2.bf16.msra.mxu0 %v2733_v4  ;;  %v2829_v4 = vld [vmem:[%s3913_s1 + $0x4a4] ss:$8 sps:$4 sm:$0xff]  }
  0x7c   :  { %1789 = vmatpush2.bf16.msra.mxu1 %v2736_v5  ;;  %1749 = vmatprep.subr.bf16.mxu0 %v2741_v6  ;;  %v2832_v5 = vld [vmem:[%s3913_s1 + $0x5a4] ss:$8 sps:$4 sm:$0xff]   ;;  %v2827_v6 = vld [vmem:[%s3913_s1 + $0x4a0] ss:$8 sps:$4 sm:$0xff]  }
  0x7d   :  { %1790 = vmatprep.subr.bf16.mxu1 %v2744_v7  ;;  %v2830_v7 = vld [vmem:[%s3913_s1 + $0x5a0] ss:$8 sps:$4 sm:$0xff]  }
  0x7f   :  { %1750 = vmatpush2.bf16.msra.mxu0 %v2739_v8  ;;  %v2835_v8 = vld [vmem:[%s3913_s1 + $0x494] ss:$8 sps:$4 sm:$0xff]  }
  0x80   :  { %1791 = vmatpush2.bf16.msra.mxu1 %v2742_v9  ;;  %1801 = vmatprep.subr.bf16.mxu0 %v2751_v10  ;;  %v2838_v9 = vld [vmem:[%s3913_s1 + $0x594] ss:$8 sps:$4 sm:$0xff]   ;;  %v2833_v10 = vld [vmem:[%s3913_s1 + $0x490] ss:$8 sps:$4 sm:$0xff]  }
  0x81   :  { %1842 = vmatprep.subr.bf16.mxu1 %v2754_v11  ;;  %v2836_v11 = vld [vmem:[%s3913_s1 + $0x590] ss:$8 sps:$4 sm:$0xff]  }
  0x82   :  { %1752 = vmatmul.mubr.bf16.vlgmr.msra.gmra.mxu0 %v2239_v12 }
  0x83   :  { %1793 = vmatmul.mubr.bf16.vlgmr.msra.gmra.mxu1 %v2241_v13  ;;  %1802 = vmatpush1.bf16.msra.mxu0 %v2749_v14 }
  0x84   :  { %1843 = vmatpush1.bf16.msra.mxu1 %v2752_v15  ;;  %1803 = vmatprep.subr.bf16.mxu0 %v2757_v16 }
  0x85   :  { %1844 = vmatprep.subr.bf16.mxu1 %v2760_v17  ;;  %1833 = vmatprep.mubr.bf16.mxu0 %v2244_v20 }
  0x86   :  { %1874 = vmatprep.mubr.bf16.mxu1 %v2246_v21 }
  0x87   :  { %1804 = vmatpush1.bf16.msra.mxu0 %v2755_v22 }
  0x88   :  { %1845 = vmatpush1.bf16.msra.mxu1 %v2758_v23  ;;  %1805 = vmatprep.subr.bf16.mxu0 %v2763_v24 }
  0x89   :  { %1846 = vmatprep.subr.bf16.mxu1 %v2766_v25 }
  0x8b   :  { %1806 = vmatpush1.bf16.msra.mxu0 %v2761_v26 }
  0x8c   :  { %1847 = vmatpush1.bf16.msra.mxu1 %v2764_v27  ;;  %1807 = vmatprep.subr.bf16.mxu0 %v2769_v28 }
  0x8d   :  { %1848 = vmatprep.subr.bf16.mxu1 %v2772_v29 }
  0x8f   :  { %1808 = vmatpush1.bf16.msra.mxu0 %v2767_v30 }
  0x90   :  { %1849 = vmatpush1.bf16.msra.mxu1 %v2770_v31  ;;  %1809 = vmatprep.subr.bf16.mxu0 %v2775_v32 }
  0x91   :  { %1850 = vmatprep.subr.bf16.mxu1 %v2778_v33 }
  0x93   :  { %1810 = vmatpush1.bf16.msra.mxu0 %v2773_v34 }
  0x94   :  { %1851 = vmatpush1.bf16.msra.mxu1 %v2776_v35  ;;  %1811 = vmatprep.subr.bf16.mxu0 %v2781_v36 }
  0x95   :  { %1852 = vmatprep.subr.bf16.mxu1 %v2784_v37 }
  0x97   :  { %1812 = vmatpush1.bf16.msra.mxu0 %v2779_v38 }
  0x98   :  { %1853 = vmatpush1.bf16.msra.mxu1 %v2782_v39  ;;  %1813 = vmatprep.subr.bf16.mxu0 %v2787_v40 }
  0x99   :  { %1854 = vmatprep.subr.bf16.mxu1 %v2790_v41 }
  0x9b   :  { %1814 = vmatpush1.bf16.msra.mxu0 %v2785_v42 }
  0x9c   :  { %1855 = vmatpush1.bf16.msra.mxu1 %v2788_v43  ;;  %1815 = vmatprep.subr.bf16.mxu0 %v2793_v44 }
  0x9d   :  { %1856 = vmatprep.subr.bf16.mxu1 %v2796_v45 }
  0x9f   :  { %1816 = vmatpush1.bf16.msra.mxu0 %v2791_v46 }
  0xa0   :  { %1857 = vmatpush1.bf16.msra.mxu1 %v2794_v47  ;;  %1817 = vmatprep.subr.bf16.mxu0 %v2799_v48 }
  0xa1   :  { %1858 = vmatprep.subr.bf16.mxu1 %v2802_v49 }
  0xa3   :  { %1818 = vmatpush2.bf16.msra.mxu0 %v2797_v50 }
  0xa4   :  { %1859 = vmatpush2.bf16.msra.mxu1 %v2800_v51  ;;  %1819 = vmatprep.subr.bf16.mxu0 %v2805_v52 }
  0xa5   :  { %1860 = vmatprep.subr.bf16.mxu1 %v2808_v53 }
  0xa7   :  { %1820 = vmatpush2.bf16.msra.mxu0 %v2803_v54 }
  0xa8   :  { %1861 = vmatpush2.bf16.msra.mxu1 %v2806_v55  ;;  %1821 = vmatprep.subr.bf16.mxu0 %v2811_v56 }
  0xa9   :  { %1862 = vmatprep.subr.bf16.mxu1 %v2814_v57 }
  0xab   :  { %1822 = vmatpush2.bf16.msra.mxu0 %v2809_v58 }
  0xac   :  { %1863 = vmatpush2.bf16.msra.mxu1 %v2812_v59  ;;  %1823 = vmatprep.subr.bf16.mxu0 %v2817_v60 }
  0xad   :  { %1864 = vmatprep.subr.bf16.mxu1 %v2820_v61 }
  0xaf   :  { %1824 = vmatpush2.bf16.msra.mxu0 %v2815_v62 }
  0xb0   :  { %1865 = vmatpush2.bf16.msra.mxu1 %v2818_v63  ;;  %1825 = vmatprep.subr.bf16.mxu0 %v2823_v0 }
  0xb1   :  { %1866 = vmatprep.subr.bf16.mxu1 %v2826_v1 }
  0xb3   :  { %1826 = vmatpush2.bf16.msra.mxu0 %v2821_v2 }
  0xb4   :  { %1867 = vmatpush2.bf16.msra.mxu1 %v2824_v3  ;;  %1827 = vmatprep.subr.bf16.mxu0 %v2829_v4 }
  0xb5   :  { %1868 = vmatprep.subr.bf16.mxu1 %v2832_v5 }
  0xb7   :  { %1828 = vmatpush2.bf16.msra.mxu0 %v2827_v6 }
  0xb8   :  { %1869 = vmatpush2.bf16.msra.mxu1 %v2830_v7 }
  0xb9   :  { %11 = vsyncpa [#allocation3], 0  ;;  %1829 = vmatprep.subr.bf16.mxu0 %v2835_v8  ;;  %1870 = vmatprep.subr.bf16.mxu1 %v2838_v9  ;;  %v2841_v12 = vld [vmem:[%s3913_s1 + $0x484] ss:$8 sps:$4 sm:$0xff]   ;;  %v2839_v14 = vld [vmem:[%s3913_s1 + $0x480] ss:$8 sps:$4 sm:$0xff]   ;;  %v2243_v20 = vcombine.low %v3453_v18, %v3453_v18  ;;  %v2245_v21 = vcombine.low %v3458_v19, %v3458_v19 }
  0xba   :  { %v2844_v13 = vld [vmem:[%s3913_s1 + $0x584] ss:$8 sps:$4 sm:$0xff]   ;;  %v2842_v15 = vld [vmem:[%s3913_s1 + $0x580] ss:$8 sps:$4 sm:$0xff]   ;;  %v2851_v16 = vld [vmem:[%s3913_s1 + $0x674] ss:$8 sps:$4 sm:$0xff]  }
  0xbb   :  { %1830 = vmatpush2.bf16.msra.mxu0 %v2833_v10  ;;  %v2854_v17 = vld [vmem:[%s3913_s1 + $0x774] ss:$8 sps:$4 sm:$0xff]   ;;  %v2849_v24 = vld [vmem:[%s3913_s1 + $0x670] ss:$8 sps:$4 sm:$0xff]   ;;  %v2857_v19 = vld [vmem:[%s3913_s1 + $0x664] ss:$8 sps:$4 sm:$0xff]  }
  0xbc   :  { %1871 = vmatpush2.bf16.msra.mxu1 %v2836_v11  ;;  %1831 = vmatprep.subr.bf16.mxu0 %v2841_v12  ;;  %v3651_v22 = vld [vmem:[%s3912_s0 + $0x30] sm:$0xff]  ;;  %v3656_v23 = vld [vmem:[%s3912_s0 + $0x38] sm:$0xff]  ;;  %v2860_v25 = vld [vmem:[%s3913_s1 + $0x764] ss:$8 sps:$4 sm:$0xff]   ;;  %vm1968_vm0 = vcmask 64512   ;;  %s2988_s24 = smov [#allocation2]  }
  0xbd   :  { %1872 = vmatprep.subr.bf16.mxu1 %v2844_v13  ;;  %v2852_v18 = vld [vmem:[%s3913_s1 + $0x770] ss:$8 sps:$4 sm:$0xff]   ;;  %v2248_v26 = vcombine.high %v3651_v22, %v3651_v22  ;;  %v2250_v27 = vcombine.high %v3656_v23, %v3656_v23  ;;  %v2855_v28 = vld [vmem:[%s3913_s1 + $0x660] ss:$8 sps:$4 sm:$0xff]   ;;  %v2863_v30 = vld [vmem:[%s3913_s1 + $0x654] ss:$8 sps:$4 sm:$0xff]  }
  0xbe   :  { %v2858_v29 = vld [vmem:[%s3913_s1 + $0x760] ss:$8 sps:$4 sm:$0xff]   ;;  %v2866_v31 = vld [vmem:[%s3913_s1 + $0x754] ss:$8 sps:$4 sm:$0xff]   ;;  %v2861_v32 = vld [vmem:[%s3913_s1 + $0x650] ss:$8 sps:$4 sm:$0xff]  }
  0xbf   :  { %1832 = vmatpush2.bf16.msra.mxu0 %v2839_v14  ;;  %v2864_v33 = vld [vmem:[%s3913_s1 + $0x750] ss:$8 sps:$4 sm:$0xff]   ;;  %v2869_v34 = vld [vmem:[%s3913_s1 + $0x644] ss:$8 sps:$4 sm:$0xff]   ;;  %v2867_v36 = vld [vmem:[%s3913_s1 + $0x640] ss:$8 sps:$4 sm:$0xff]   ;;  %v291_v14 = vlaneseq }
  0xc0   :  { %1873 = vmatpush2.bf16.msra.mxu1 %v2842_v15  ;;  %1883 = vmatprep.subr.bf16.mxu0 %v2851_v16  ;;  %v2872_v35 = vld [vmem:[%s3913_s1 + $0x744] ss:$8 sps:$4 sm:$0xff]   ;;  %v2870_v37 = vld [vmem:[%s3913_s1 + $0x740] ss:$8 sps:$4 sm:$0xff]   ;;  %v2875_v38 = vld [vmem:[%s3913_s1 + $0x634] ss:$8 sps:$4 sm:$0xff]  }
  0xc1   :  { %1924 = vmatprep.subr.bf16.mxu1 %v2854_v17  ;;  %v2878_v39 = vld [vmem:[%s3913_s1 + $0x734] ss:$8 sps:$4 sm:$0xff]   ;;  %v2873_v40 = vld [vmem:[%s3913_s1 + $0x630] ss:$8 sps:$4 sm:$0xff]   ;;  %v2881_v42 = vld [vmem:[%s3913_s1 + $0x624] ss:$8 sps:$4 sm:$0xff]  }
  0xc2   :  { %1834 = vmatmul.mubr.bf16.vlgmr.msra.gmra.mxu0 %v2243_v20  ;;  %v2876_v41 = vld [vmem:[%s3913_s1 + $0x730] ss:$8 sps:$4 sm:$0xff]   ;;  %v2884_v43 = vld [vmem:[%s3913_s1 + $0x724] ss:$8 sps:$4 sm:$0xff]   ;;  %v2879_v44 = vld [vmem:[%s3913_s1 + $0x620] ss:$8 sps:$4 sm:$0xff]  }
  0xc3   :  { %1875 = vmatmul.mubr.bf16.vlgmr.msra.gmra.mxu1 %v2245_v21  ;;  %1884 = vmatpush1.bf16.msra.mxu0 %v2849_v24  ;;  %v2882_v45 = vld [vmem:[%s3913_s1 + $0x720] ss:$8 sps:$4 sm:$0xff]   ;;  %v2887_v46 = vld [vmem:[%s3913_s1 + $0x614] ss:$8 sps:$4 sm:$0xff]   ;;  %v2885_v48 = vld [vmem:[%s3913_s1 + $0x610] ss:$8 sps:$4 sm:$0xff]  }
  0xc4   :  { %1925 = vmatpush1.bf16.msra.mxu1 %v2852_v18  ;;  %1885 = vmatprep.subr.bf16.mxu0 %v2857_v19  ;;  %v2890_v47 = vld [vmem:[%s3913_s1 + $0x714] ss:$8 sps:$4 sm:$0xff]   ;;  %v2888_v49 = vld [vmem:[%s3913_s1 + $0x710] ss:$8 sps:$4 sm:$0xff]   ;;  %v2893_v50 = vld [vmem:[%s3913_s1 + $0x604] ss:$8 sps:$4 sm:$0xff]  }
  0xc5   :  { %1926 = vmatprep.subr.bf16.mxu1 %v2860_v25  ;;  %1915 = vmatprep.mubr.bf16.mxu0 %v2248_v26  ;;  %v2896_v51 = vld [vmem:[%s3913_s1 + $0x704] ss:$8 sps:$4 sm:$0xff]   ;;  %v2891_v52 = vld [vmem:[%s3913_s1 + $0x600] ss:$8 sps:$4 sm:$0xff]   ;;  %v2899_v54 = vld [vmem:[%s3913_s1 + $0x6f4] ss:$8 sps:$4 sm:$0xff]  }
  0xc6   :  { %1956 = vmatprep.mubr.bf16.mxu1 %v2250_v27  ;;  %v2894_v53 = vld [vmem:[%s3913_s1 + $0x700] ss:$8 sps:$4 sm:$0xff]   ;;  %v2902_v55 = vld [vmem:[%s3913_s1 + $0x7f4] ss:$8 sps:$4 sm:$0xff]   ;;  %v2897_v56 = vld [vmem:[%s3913_s1 + $0x6f0] ss:$8 sps:$4 sm:$0xff]  }
  0xc7   :  { %1886 = vmatpush1.bf16.msra.mxu0 %v2855_v28  ;;  %v2900_v57 = vld [vmem:[%s3913_s1 + $0x7f0] ss:$8 sps:$4 sm:$0xff]   ;;  %v2905_v58 = vld [vmem:[%s3913_s1 + $0x6e4] ss:$8 sps:$4 sm:$0xff]   ;;  %v2903_v60 = vld [vmem:[%s3913_s1 + $0x6e0] ss:$8 sps:$4 sm:$0xff]  }
  0xc8   :  { %1927 = vmatpush1.bf16.msra.mxu1 %v2858_v29  ;;  %1887 = vmatprep.subr.bf16.mxu0 %v2863_v30  ;;  %v2908_v59 = vld [vmem:[%s3913_s1 + $0x7e4] ss:$8 sps:$4 sm:$0xff]   ;;  %v2906_v61 = vld [vmem:[%s3913_s1 + $0x7e0] ss:$8 sps:$4 sm:$0xff]   ;;  %v2911_v62 = vld [vmem:[%s3913_s1 + $0x6d4] ss:$8 sps:$4 sm:$0xff]   ;;  %v2247_v29 = vcombine.low %v3651_v22, %v3651_v22  ;;  %v2249_v30 = vcombine.low %v3656_v23, %v3656_v23 }
  0xc9   :  { %1928 = vmatprep.subr.bf16.mxu1 %v2866_v31  ;;  %v2914_v63 = vld [vmem:[%s3913_s1 + $0x7d4] ss:$8 sps:$4 sm:$0xff]   ;;  %v2909_v0 = vld [vmem:[%s3913_s1 + $0x6d0] ss:$8 sps:$4 sm:$0xff]   ;;  %v2917_v2 = vld [vmem:[%s3913_s1 + $0x6c4] ss:$8 sps:$4 sm:$0xff]  }
  0xca   :  { %v2912_v1 = vld [vmem:[%s3913_s1 + $0x7d0] ss:$8 sps:$4 sm:$0xff]   ;;  %v2920_v3 = vld [vmem:[%s3913_s1 + $0x7c4] ss:$8 sps:$4 sm:$0xff]   ;;  %v2915_v4 = vld [vmem:[%s3913_s1 + $0x6c0] ss:$8 sps:$4 sm:$0xff]  }
  0xcb   :  { %1888 = vmatpush1.bf16.msra.mxu0 %v2861_v32  ;;  %v2918_v5 = vld [vmem:[%s3913_s1 + $0x7c0] ss:$8 sps:$4 sm:$0xff]   ;;  %v2923_v6 = vld [vmem:[%s3913_s1 + $0x6b4] ss:$8 sps:$4 sm:$0xff]   ;;  %v2921_v8 = vld [vmem:[%s3913_s1 + $0x6b0] ss:$8 sps:$4 sm:$0xff]  }
  0xcc   :  { %1929 = vmatpush1.bf16.msra.mxu1 %v2864_v33  ;;  %1889 = vmatprep.subr.bf16.mxu0 %v2869_v34  ;;  %v2926_v7 = vld [vmem:[%s3913_s1 + $0x7b4] ss:$8 sps:$4 sm:$0xff]   ;;  %v2924_v9 = vld [vmem:[%s3913_s1 + $0x7b0] ss:$8 sps:$4 sm:$0xff]   ;;  %v2929_v10 = vld [vmem:[%s3913_s1 + $0x6a4] ss:$8 sps:$4 sm:$0xff]  }
  0xcd   :  { %1930 = vmatprep.subr.bf16.mxu1 %v2872_v35  ;;  %v2932_v11 = vld [vmem:[%s3913_s1 + $0x7a4] ss:$8 sps:$4 sm:$0xff]   ;;  %v2927_v12 = vld [vmem:[%s3913_s1 + $0x6a0] ss:$8 sps:$4 sm:$0xff]   ;;  %v2935_v15 = vld [vmem:[%s3913_s1 + $0x694] ss:$8 sps:$4 sm:$0xff]  }
  0xce   :  { %v2930_v13 = vld [vmem:[%s3913_s1 + $0x7a0] ss:$8 sps:$4 sm:$0xff]   ;;  %v2938_v16 = vld [vmem:[%s3913_s1 + $0x794] ss:$8 sps:$4 sm:$0xff]   ;;  %v2933_v17 = vld [vmem:[%s3913_s1 + $0x690] ss:$8 sps:$4 sm:$0xff]  }
  0xcf   :  { %1890 = vmatpush1.bf16.msra.mxu0 %v2867_v36  ;;  %v2936_v20 = vld [vmem:[%s3913_s1 + $0x790] ss:$8 sps:$4 sm:$0xff]   ;;  %v292_v21 = vshrl.u32 %v291_v14, 7  ;;  %v2941_v24 = vld [vmem:[%s3913_s1 + $0x684] ss:$8 sps:$4 sm:$0xff]   ;;  %s2227_s0 = sshll.u32 %s2988_s24, 4  ;;  %s2228_s0 = int_to_ptr.vmem [resolvable:$true] %s2227_s0 }
  0xd0   :  { %1931 = vmatpush1.bf16.msra.mxu1 %v2870_v37  ;;  %1891 = vmatprep.subr.bf16.mxu0 %v2875_v38  ;;  %v2944_v18 = vld [vmem:[%s3913_s1 + $0x784] ss:$8 sps:$4 sm:$0xff]   ;;  %v2939_v19 = vld [vmem:[%s3913_s1 + $0x680] ss:$8 sps:$4 sm:$0xff]   ;;  %p2970_p1 = scmp.lt.s32.totalorder %s2228_s0, %s2228_s0 }
  0xd1   :  { %1932 = vmatprep.subr.bf16.mxu1 %v2878_v39  ;;  %v2942_v25 = vld [vmem:[%s3913_s1 + $0x780] ss:$8 sps:$4 sm:$0xff]   ;;  %v293_v26 = vsub.s32 0, %v292_v21  ;;  %v297_v28 = vsub.s32 1, %v292_v21 }
  0xd2   :  { %v289_v27 = vld [vmem:[%s3914_s2] sm:$0x3] }
  0xd3   :  { %1892 = vmatpush1.bf16.msra.mxu0 %v2873_v40  ;;  %v294_v31 = vrot.slane %v289_v27, %v293_v26  ;;  %v298_v32 = vrot.slane %v289_v27, %v297_v28 }
  0xd4   :  { %1933 = vmatpush1.bf16.msra.mxu1 %v2876_v41  ;;  %1893 = vmatprep.subr.bf16.mxu0 %v2881_v42 }
  0xd5   :  { %1934 = vmatprep.subr.bf16.mxu1 %v2884_v43 }
  0xd7   :  { %1894 = vmatpush1.bf16.msra.mxu0 %v2879_v44 }
  0xd8   :  { %1935 = vmatpush1.bf16.msra.mxu1 %v2882_v45  ;;  %1895 = vmatprep.subr.bf16.mxu0 %v2887_v46 }
  0xd9   :  { %1936 = vmatprep.subr.bf16.mxu1 %v2890_v47 }
  0xdb   :  { %1896 = vmatpush1.bf16.msra.mxu0 %v2885_v48 }
  0xdc   :  { %1937 = vmatpush1.bf16.msra.mxu1 %v2888_v49  ;;  %1897 = vmatprep.subr.bf16.mxu0 %v2893_v50 }
  0xdd   :  { %1938 = vmatprep.subr.bf16.mxu1 %v2896_v51 }
  0xdf   :  { %1898 = vmatpush1.bf16.msra.mxu0 %v2891_v52 }
  0xe0   :  { %1939 = vmatpush1.bf16.msra.mxu1 %v2894_v53  ;;  %1899 = vmatprep.subr.bf16.mxu0 %v2899_v54 }
  0xe1   :  { %1940 = vmatprep.subr.bf16.mxu1 %v2902_v55  ;;  %v2987_v55 = vmov 0.0  }
  0xe3   :  { %1900 = vmatpush2.bf16.msra.mxu0 %v2897_v56  ;;  %v2949_v56 = vld [vmem:[%s3916_s4 + $0x78] sm:$0xff]  }
  0xe4   :  { %1941 = vmatpush2.bf16.msra.mxu1 %v2900_v57  ;;  %1901 = vmatprep.subr.bf16.mxu0 %v2905_v58  ;;  %v2950_v57 = vld [vmem:[%s3916_s4 + $0x38] sm:$0xff]   ;;  %v2951_v58 = vld [vmem:[%s3916_s4 + $0x70] sm:$0xff]  }
  0xe5   :  { %1942 = vmatprep.subr.bf16.mxu1 %v2908_v59  ;;  %v2952_v59 = vld [vmem:[%s3916_s4 + $0x30] sm:$0xff]  }
  0xe7   :  { %1902 = vmatpush2.bf16.msra.mxu0 %v2903_v60  ;;  %v2953_v60 = vld [vmem:[%s3916_s4 + $0x68] sm:$0xff]  }
  0xe8   :  { %1943 = vmatpush2.bf16.msra.mxu1 %v2906_v61  ;;  %1903 = vmatprep.subr.bf16.mxu0 %v2911_v62  ;;  %v2954_v61 = vld [vmem:[%s3916_s4 + $0x28] sm:$0xff]   ;;  %v2955_v62 = vld [vmem:[%s3916_s4 + $0x60] sm:$0xff]  }
  0xe9   :  { %1944 = vmatprep.subr.bf16.mxu1 %v2914_v63  ;;  %v2956_v63 = vld [vmem:[%s3916_s4 + $0x20] sm:$0xff]  }
  0xeb   :  { %1904 = vmatpush2.bf16.msra.mxu0 %v2909_v0  ;;  %v2957_v0 = vld [vmem:[%s3916_s4 + $0x58] sm:$0xff]  }
  0xec   :  { %1945 = vmatpush2.bf16.msra.mxu1 %v2912_v1  ;;  %1905 = vmatprep.subr.bf16.mxu0 %v2917_v2  ;;  %v2958_v1 = vld [vmem:[%s3916_s4 + $0x18] sm:$0xff]   ;;  %v2959_v2 = vld [vmem:[%s3916_s4 + $0x50] sm:$0xff]  }
  0xed   :  { %1946 = vmatprep.subr.bf16.mxu1 %v2920_v3  ;;  %v2960_v3 = vld [vmem:[%s3916_s4 + $0x10] sm:$0xff]  }
  0xef   :  { %1906 = vmatpush2.bf16.msra.mxu0 %v2915_v4  ;;  %v2961_v4 = vld [vmem:[%s3916_s4 + $0x48] sm:$0xff]  }
  0xf0   :  { %1947 = vmatpush2.bf16.msra.mxu1 %v2918_v5  ;;  %1907 = vmatprep.subr.bf16.mxu0 %v2923_v6  ;;  %v2962_v5 = vld [vmem:[%s3916_s4 + $0x8] sm:$0xff]  }
  0xf1   :  { %1948 = vmatprep.subr.bf16.mxu1 %v2926_v7 }
  0xf3   :  { %1908 = vmatpush2.bf16.msra.mxu0 %v2921_v8 }
  0xf4   :  { %1949 = vmatpush2.bf16.msra.mxu1 %v2924_v9  ;;  %1909 = vmatprep.subr.bf16.mxu0 %v2929_v10 }
  0xf5   :  { %1950 = vmatprep.subr.bf16.mxu1 %v2932_v11 }
  0xf7   :  { %1910 = vmatpush2.bf16.msra.mxu0 %v2927_v12 }
  0xf8   :  { %1951 = vmatpush2.bf16.msra.mxu1 %v2930_v13  ;;  %1911 = vmatprep.subr.bf16.mxu0 %v2935_v15 }
  0xf9   :  { %1952 = vmatprep.subr.bf16.mxu1 %v2938_v16 }
  0xfb   :  { %1912 = vmatpush2.bf16.msra.mxu0 %v2933_v17 }
  0xfc   :  { %1953 = vmatpush2.bf16.msra.mxu1 %v2936_v20  ;;  %1913 = vmatprep.subr.bf16.mxu0 %v2941_v24 }
  0xfd   :  { %1954 = vmatprep.subr.bf16.mxu1 %v2944_v18 }
  0xff   :  { %1914 = vmatpush2.bf16.msra.mxu0 %v2939_v19 }
 0x100   :  { %1955 = vmatpush2.bf16.msra.mxu1 %v2942_v25 }
 0x101   :  { %2525 = vmatprep.subr.bf16.mxu1 %v2949_v56 }
 0x102   :  { %v1671_v33 = vpop.f32.mrf.mxu0  ;;  %1916 = vmatmul.mubr.bf16.vlgmr.msra.gmra.mxu0 %v2247_v29 }
 0x103   :  { %v1712_v34 = vpop.f32.mrf.mxu1  ;;  %1957 = vmatmul.mubr.bf16.vlgmr.msra.gmra.mxu1 %v2249_v30  ;;  %v1672_v35 = vadd.f32 %v1671_v33, %v294_v31  ;;  %2036 = vmatprep.mubr.f32.mxu0 %v2987_v55 }
 0x104   :  { %v1673_v36 = vpop.f32.mrf.mxu0  ;;  %2526 = vmatpush3.bf16.msra.mxu1 %v2950_v57 }
 0x105   :  { %v1714_v37 = vpop.f32.mrf.mxu1  ;;  %v1713_v38 = vadd.f32 %v1712_v34, %v1672_v35  ;;  %v1674_v39 = vadd.f32 %v1673_v36, %v298_v32  ;;  %2527 = vmatprep.subr.bf16.mxu1 %v2951_v58  ;;  %v1967_v34 = vld [vmem:[%s3915_s3] sm:$0x3] }
 0x106   :  { %v1675_v40 = vpop.f32.mrf.mxu0  ;;  %v2963_v35 = vld [vmem:[%s3916_s4 + $0x40] sm:$0xff]  }
 0x107   :  { %v1716_v41 = vpop.f32.mrf.mxu1  ;;  %v1715_v42 = vadd.f32 %v1714_v37, %v1674_v39  ;;  %v2964_v36 = vld [vmem:[%s3916_s4] sm:$0xff]   ;;  %s2965_s4 = scalar_lea.vmem %s2228_s0, 32 }
 0x108   :  { %v1676_v22 = vpop.f32.mrf.mxu0  ;;  %2528 = vmatpush3.bf16.msra.mxu1 %v2952_v59  ;;  %p2966_p0 = scmp.ne.s32.totalorder %s2228_s0, %s2965_s4  ;;  %p2971_p2 = scmp.lt.s32.totalorder %s2965_s4, %s2965_s4 }
 0x109   :  { %v1717_v43 = vpop.f32.mrf.mxu1  ;;  %2529 = vmatprep.subr.bf16.mxu1 %v2953_v60  ;;  %v2508_v22 = vld [vmem:[%s3917_s5] ss:$0 sm:$0xff] }
 0x10a   :  { %p2972_p3 = por %p2971_p2, %p2970_p1 }
 0x10c   :  { %2530 = vmatpush3.bf16.msra.mxu1 %v2954_v61  ;;  %p2973_p4 = pnand %p2972_p3, %p2966_p0 }
 0x10d   :  { %2531 = vmatprep.subr.bf16.mxu1 %v2955_v62 }
 0x110   :  { %2532 = vmatpush3.bf16.msra.mxu1 %v2956_v63 }
 0x111   :  { %2533 = vmatprep.subr.bf16.mxu1 %v2957_v0 }
 0x114   :  { %2534 = vmatpush3.bf16.msra.mxu1 %v2958_v1 }
 0x115   :  { %2535 = vmatprep.subr.bf16.mxu1 %v2959_v2 }
 0x118   :  { %2536 = vmatpush3.bf16.msra.mxu1 %v2960_v3 }
 0x119   :  { %2537 = vmatprep.subr.bf16.mxu1 %v2961_v4 }
 0x11c   :  { %2538 = vmatpush3.bf16.msra.mxu1 %v2962_v5 }
 0x11d   :  { %2539 = vmatprep.subr.bf16.mxu1 %v2963_v35 }
 0x120   :  { %2540 = vmatpush3.bf16.msra.mxu1 %v2964_v36 }
 0x142   :  { %v1753_v44 = vpop.f32.mrf.mxu0 }
 0x143   :  { %v1794_v23 = vpop.f32.mrf.mxu1  ;;  %v1754_v45 = vadd.f32 %v1753_v44, %v1713_v38 }
 0x144   :  { %v1755_v46 = vpop.f32.mrf.mxu0 }
 0x145   :  { %v1796_v47 = vpop.f32.mrf.mxu1  ;;  %v1795_v48 = vadd.f32 %v1794_v23, %v1754_v45  ;;  %v1756_v49 = vadd.f32 %v1755_v46, %v1715_v42 }
 0x146   :  { %v1757_v50 = vpop.f32.mrf.mxu0 }
 0x147   :  { %v1798_v51 = vpop.f32.mrf.mxu1  ;;  %v1797_v52 = vadd.f32 %v1796_v47, %v1756_v49 }
 0x148   :  { %v1758_v53 = vpop.f32.mrf.mxu0 }
 0x149   :  { %v1799_v54 = vpop.f32.mrf.mxu1 }
 0x182   :  { %v1835_v6 = vpop.f32.mrf.mxu0 }
 0x183   :  { %v1876_v7 = vpop.f32.mrf.mxu1  ;;  %v1836_v8 = vadd.f32 %v1835_v6, %v1795_v48 }
 0x184   :  { %v1837_v9 = vpop.f32.mrf.mxu0 }
 0x185   :  { %v1878_v10 = vpop.f32.mrf.mxu1  ;;  %v1877_v11 = vadd.f32 %v1876_v7, %v1836_v8  ;;  %v1838_v16 = vadd.f32 %v1837_v9, %v1797_v52 }
 0x186   :  { %v1839_v12 = vpop.f32.mrf.mxu0 }
 0x187   :  { %v1880_v13 = vpop.f32.mrf.mxu1  ;;  %v1879_v21 = vadd.f32 %v1878_v10, %v1838_v16 }
 0x188   :  { %v1840_v14 = vpop.f32.mrf.mxu0 }
 0x189   :  { %v1881_v15 = vpop.f32.mrf.mxu1 }
 0x1c2   :  { %v1917_v17 = vpop.f32.mrf.mxu0 }
 0x1c3   :  { %v1958_v20 = vpop.f32.mrf.mxu1  ;;  %v1918_v24 = vadd.f32 %v1917_v17, %v1877_v11 }
 0x1c4   :  { %v1919_v18 = vpop.f32.mrf.mxu0 }
 0x1c5   :  { %v1960_v19 = vpop.f32.mrf.mxu1  ;;  %v1920_v25 = vadd.f32 %v1919_v18, %v1879_v21  ;;  %v1959_v26 = vadd.f32 %v1958_v20, %v1918_v24 }
 0x1c6   :  { %v1921_v27 = vpop.f32.mrf.mxu0 }
 0x1c7   :  { %v1962_v28 = vpop.f32.mrf.mxu1  ;;  %v1961_v29 = vadd.f32 %v1960_v19, %v1920_v25  ;;  %v1965_v33 = vmax.f32 %v1959_v26, 0.0 }
 0x1c8   :  { %v1922_v30 = vpop.f32.mrf.mxu0 }
 0x1c9   :  { %v1963_v31 = vpop.f32.mrf.mxu1  ;;  %v1966_v32 = vmax.f32 %v1961_v29, 0.0 }
 0x1cb   :  { %2002 = vmatprep.subr.mxu0 %v1966_v32 }
 0x1cc   :  { %2003 = vmatpush1.msra.mxu0 %v1965_v33 }
 0x1cd   :  { %2507 = vmatmul.mubr.msk.f32.vlgmr.msra.gmra.mxu0 %vm1968_vm0, %v1967_v34 }
 0x28d   :  { %v2038_v37 = vpop.f32.mrf.mxu0 }
 0x28e   :  { %v2043_v40 = vpack.c.bf16 %v2038_v37, %v2038_v37 }
 0x28f   :  { %v2040_v38 = vpop.f32.mrf.mxu0 }
 0x290   :  { %v2044_v39 = vpack.c.bf16 %v2040_v38, %v2040_v38 }
 0x292   :  { %2212 = vmatprep.mubr.bf16.mxu1 %v2044_v39 }
 0x293   :  { %2213 = vmatmul.mubr.bf16.vlgmr.msra.gmra.mxu1 %v2043_v40 }
 0x353   :  { %v2541_v41 = vpop.f32.mrf.mxu1 }
 0x355   :  { %v2542_v42 = vpop.f32.mrf.mxu1 }
 0x356   :  { %v2543_v43 = vadd.f32 %v2542_v42, %v2541_v41 }
 0x357   :  { %v2544_v44 = vpop.f32.mrf.mxu1 }
 0x358   :  { %v2215_v23 = vadd.f32 %v2543_v43, %v2508_v22 }
 0x359   :  { %v2545_v45 = vpop.f32.mrf.mxu1 }
 0x35a   :  { %2220 = vst [vmem:[#allocation2] sm:$0x3] %v2215_v23 }
 0x35b   :  { %2976 = shalt.err (!%p2973_p4)
}
 0x35c   :  { %2230 = dma.vmem_to_hbm [thread:$0]  %s2228_s0, 32, %s3918_s6, [#allocation3]  }
 0x35d   :  { %2985 = dma.done.wait [#allocation3], 32  }
 0x35e   :  { %2986 = vsyncadd [#allocation3], 4294967264 }
 0x35f   :  { %2234 = vsyncpa [#allocation3], 1 }

</bundles_post_ra>
